<compile_context>
chip_gen: v5e
topology: v5e:2x2
jax: 0.10.0
libtpu: 0.0.40
codegen_flags: <defaults>
</compile_context>

<pallas_src>
import jax
import jax.numpy as jnp
from jax import lax
from jax.experimental import pallas as pl
from jax.experimental.pallas import tpu as pltpu

K = 7          # largest branch kernel; all branches embedded into a 7x7 weight
PAD = 3        # SAME padding for the 7x7 kernel


def inception_gemm_kernel(wt_ref, pt_ref, b_ref, o_ref):
    """Fused inception block as one GEMM tile.

    wt_ref: (Cout, K*K*Cin)  combined (all branches + downsample) weight
    pt_ref: (K*K*Cin, Mt)    transposed im2col patches for Mt output pixels
    b_ref : (Cout, 1)        folded BN bias
    o_ref : (Cout, Mt)       lane-dense output slab
    """
    acc = jnp.dot(wt_ref[...], pt_ref[...],
                  preferred_element_type=jnp.float32,
                  precision=lax.Precision.HIGHEST)
    acc = acc + b_ref[...]                                 # bias over lanes
    o_ref[...] = jnp.maximum(acc, 0.0).astype(o_ref.dtype)  # ReLU


def combine_weights(w1, w3, w5, w7, wd):
    """Embed all branch weights + 1x1 downsample into one (7,7,Cin,Cout)."""
    Cq = w1.shape[3]
    Cout = wd.shape[3]

    def placed(w, c_off, c_width):
        k = w.shape[0]
        s = (K - k) // 2
        return jnp.pad(w, ((s, K - k - s), (s, K - k - s), (0, 0),
                           (c_off, Cout - c_off - c_width)))

    return (placed(w1, 0, Cq) + placed(w3, Cq, Cq) + placed(w5, 2 * Cq, Cq)
            + placed(w7, 3 * Cq, Cq) + placed(wd, 0, Cout))


def _grid_parallelism():
    """2 where one Pallas grid drives 2 TensorCores (v7x / megacore), else 1."""
    try:
        kind = jax.devices()[0].device_kind.lower()
    except Exception:
        return 1
    if "v5 lite" in kind or "v5e" in kind or "v6" in kind:
        return 1            # single TC: collapse the grid (per-step overhead)
    if "7" in kind or "v4" in kind or "v5" in kind:
        return 2            # 2 TCs per chip: keep a 2-way "parallel" axis
    return 1


def inception_forward(x_nchw, params):
    """x_nchw: (N, Cin, H, W) float32 -> (N, Cout, H, W) float32."""
    x = jnp.transpose(x_nchw, (0, 2, 3, 1))                  # NHWC
    N, H, W, Cin = x.shape
    w1, w3, w5, w7, wd, bias = params
    Cout = wd.shape[-1]
    Kp = K * K * Cin                                         # contraction dim
    M = N * H * W                                            # output pixels

    # Combined weight, pre-flattened for the GEMM: (Cout, Kp).
    wt = combine_weights(w1, w3, w5, w7, wd).reshape(Kp, Cout).T

    # im2col (transposed): rows = (dy, dx, cin), cols = (n, h, w).
    xp = jnp.pad(x, ((0, 0), (PAD, PAD), (PAD, PAD), (0, 0)))
    taps = [xp[:, dy:dy + H, dx:dx + W, :]
            for dy in range(K) for dx in range(K)]           # 49 x (N,H,W,Cin)
    patches_t = (jnp.stack(taps, axis=0)                     # (49,N,H,W,Cin)
                 .transpose(0, 4, 1, 2, 3)                   # (49,Cin,N,H,W)
                 .reshape(Kp, M))                            # (196, M)

    bias_col = bias.reshape(Cout, 1)

    g = _grid_parallelism()
    if g < 1 or M % (128 * g) != 0:
        g = 1
    Mt = M // g

    out_t = pl.pallas_call(
        inception_gemm_kernel,
        out_shape=jax.ShapeDtypeStruct((Cout, M), jnp.float32),
        grid_spec=pltpu.PrefetchScalarGridSpec(
            num_scalar_prefetch=0,
            grid=(g,),
            in_specs=[
                pl.BlockSpec((Cout, Kp), lambda i: (0, 0)),
                pl.BlockSpec((Kp, Mt), lambda i: (0, i)),
                pl.BlockSpec((Cout, 1), lambda i: (0, 0)),
            ],
            out_specs=pl.BlockSpec((Cout, Mt), lambda i: (0, i)),
        ),
        compiler_params=pltpu.CompilerParams(
            dimension_semantics=("parallel",)),
        cost_estimate=pl.CostEstimate(
            flops=2 * M * Kp * Cout,
            transcendentals=0,
            bytes_accessed=4 * (Kp * M + Cout * Kp + Cout * M)),
    )(wt, patches_t, bias_col)

    out = out_t.reshape(Cout, N, H, W)                       # free view
    return jnp.transpose(out, (1, 0, 2, 3))                  # back to NCHW


def make_params(key, in_channels, out_channel, eps=1e-5):
    """Deterministic weights; BN (eval mode) folded into conv weights + bias."""
    cq = out_channel // 4
    keys = jax.random.split(key, 32)                 # 5 convs + 5 BNs * 4 keys
    ki = iter(keys)

    def conv_w(k, cout):
        # HWIO layout: (k, k, Cin, Cout)
        fan_in = in_channels * k * k
        return jax.random.normal(next(ki), (k, k, in_channels, cout),
                                 jnp.float32) / jnp.sqrt(fan_in)

    def bn(c):
        gamma = 1.0 + 0.1 * jax.random.normal(next(ki), (c,), jnp.float32)
        beta = 0.1 * jax.random.normal(next(ki), (c,), jnp.float32)
        mean = 0.1 * jax.random.normal(next(ki), (c,), jnp.float32)
        var = jnp.abs(1.0 + 0.1 * jax.random.normal(next(ki), (c,),
                                                    jnp.float32))
        scale = gamma / jnp.sqrt(var + eps)
        bias = beta - mean * scale
        return scale, bias

    raw = {
        "w1": conv_w(1, cq), "w3": conv_w(3, cq),
        "w5": conv_w(5, cq), "w7": conv_w(7, cq),
        "wd": conv_w(1, out_channel),
    }
    s1, b1 = bn(cq)
    s3, b3 = bn(cq)
    s5, b5 = bn(cq)
    s7, b7 = bn(cq)
    sd, bd = bn(out_channel)

    # Fold BN scale into conv output channels.
    w1 = raw["w1"] * s1
    w3 = raw["w3"] * s3
    w5 = raw["w5"] * s5
    w7 = raw["w7"] * s7
    wd = raw["wd"] * sd
    bias_total = jnp.concatenate([b1, b3, b5, b7]) + bd
    return (w1, w3, w5, w7, wd, bias_total)


def reference_forward(x_nchw, params):
    """Pure-JAX reference (conv_general_dilated) for validation."""
    x = jnp.transpose(x_nchw, (0, 2, 3, 1))
    w1, w3, w5, w7, wd, bias = params

    def conv(xx, w):
        return lax.conv_general_dilated(
            xx, w, window_strides=(1, 1), padding="SAME",
            dimension_numbers=("NHWC", "HWIO", "NHWC"),
            precision=lax.Precision.HIGHEST)

    o = jnp.concatenate([conv(x, w1), conv(x, w3), conv(x, w5), conv(x, w7)],
                        axis=-1)
    out = jnp.maximum(o + conv(x, wd) + bias.reshape(1, 1, 1, -1), 0.0)
    return jnp.transpose(out, (0, 3, 1, 2))


if __name__ == "__main__":
    key = jax.random.PRNGKey(0)
    kx, kp = jax.random.split(key)

    N, Cin, H, W = 2, 4, 16, 16
    out_channel = 16

    x = jax.random.normal(kx, (N, Cin, H, W), jnp.float32)
    params = make_params(kp, Cin, out_channel)

    fwd = jax.jit(inception_forward)
    out = jax.block_until_ready(fwd(x, params))
    ref = jax.block_until_ready(reference_forward(x, params))

    assert out.shape == (N, out_channel, H, W), out.shape
    assert jnp.allclose(out, ref, rtol=1e-4, atol=1e-4), (
        float(jnp.max(jnp.abs(out - ref))))
    print("KERNEL_OK")
</pallas_src>

<mosaic_0001>
module attributes {stable_mosaic.version = 11 : i64} {
  func.func @inception_gemm_kernel(%arg0: i32, %arg1: memref<16x196xf32, #tpu.memory_space<vmem>>, %arg2: memref<196x512xf32, #tpu.memory_space<vmem>>, %arg3: memref<16x1xf32, #tpu.memory_space<vmem>>, %arg4: memref<16x512xf32, #tpu.memory_space<vmem>>) attributes {dimension_semantics = [#tpu.dimension_semantics<parallel>], iteration_bounds = array<i64: 1>, scalar_prefetch = 0 : i64, scratch_operands = 0 : i64, tpu.core_type = #tpu.core_type<tc>, window_params = [{pipeline_mode = #tpu.pipeline_mode<synchronous>, transform_indices = @transform_0, window_bounds = array<i64: 16, 196>}, {transform_indices = @transform_1, window_bounds = array<i64: 196, 512>}, {pipeline_mode = #tpu.pipeline_mode<synchronous>, transform_indices = @transform_2, window_bounds = array<i64: 16, 1>}, {transform_indices = @transform_3, window_bounds = array<i64: 16, 512>}]} {
    %c0 = arith.constant 0 : index
    %c0_0 = arith.constant 0 : index
    %0 = vector.load %arg1[%c0, %c0_0] : memref<16x196xf32, #tpu.memory_space<vmem>>, vector<16x196xf32>
    %c0_1 = arith.constant 0 : index
    %c0_2 = arith.constant 0 : index
    %1 = vector.load %arg2[%c0_1, %c0_2] : memref<196x512xf32, #tpu.memory_space<vmem>>, vector<196x512xf32>
    %cst = arith.constant dense<0.000000e+00> : vector<16x512xf32>
    %2 = tpu.matmul %0, %1, %cst {dimension_numbers = #tpu.dot_dimension_numbers<[1], [0], [0], [1], [0, 0, 1, 1], [], []>, precision = #tpu.contract_precision<fp32>} : vector<16x196xf32>, vector<196x512xf32>, vector<16x512xf32> -> vector<16x512xf32>
    %c0_3 = arith.constant 0 : index
    %c0_4 = arith.constant 0 : index
    %3 = vector.load %arg3[%c0_3, %c0_4] : memref<16x1xf32, #tpu.memory_space<vmem>>, vector<16x1xf32>
    %4 = vector.broadcast %3 : vector<16x1xf32> to vector<16x512xf32>
    %5 = arith.addf %2, %4 : vector<16x512xf32>
    %cst_5 = arith.constant 0.000000e+00 : f32
    %6 = vector.broadcast %cst_5 : f32 to vector<16x512xf32>
    %7 = arith.maximumf %5, %6 : vector<16x512xf32>
    %c0_6 = arith.constant 0 : index
    %c0_7 = arith.constant 0 : index
    %8 = vector.load %arg4[%c0_6, %c0_7] : memref<16x512xf32, #tpu.memory_space<vmem>>, vector<16x512xf32>
    tpu.vector_store %arg4[%c0_6, %c0_7], %7 {strides = array<i32>} : memref<16x512xf32, #tpu.memory_space<vmem>>, vector<16x512xf32>,
    return
  }
  func.func @transform_0(%arg0: i32) -> (i32, i32) {
    %c0_i32 = arith.constant 0 : i32
    %c0_i32_0 = arith.constant 0 : i32
    %c0_i32_1 = arith.constant 0 : i32
    return %c0_i32, %c0_i32_0 : i32, i32
  }
  func.func @transform_1(%arg0: i32) -> (i32, i32) {
    %c0_i32 = arith.constant 0 : i32
    %c0_i32_0 = arith.constant 0 : i32
    return %c0_i32, %arg0 : i32, i32
  }
  func.func @transform_2(%arg0: i32) -> (i32, i32) {
    %c0_i32 = arith.constant 0 : i32
    %c0_i32_0 = arith.constant 0 : i32
    %c0_i32_1 = arith.constant 0 : i32
    return %c0_i32, %c0_i32_0 : i32, i32
  }
  func.func @transform_3(%arg0: i32) -> (i32, i32) {
    %c0_i32 = arith.constant 0 : i32
    %c0_i32_0 = arith.constant 0 : i32
    return %c0_i32, %arg0 : i32, i32
  }
}

</mosaic_0001>

<bundles_post_ra>
// kernel: inception_forward.1
= control target key start
LH: loop header
LB: loop body
LE: loop exit
PB: predicated region body
PF: predicated region fallthrough
CT: control target
= control target key end

     0   :  { %vm137_vm0 = vcmask 1043456   ;;  %vm130_vm1 = vcmask 556032   ;;  %s4851_s1 = inlined_call_operand.vmem [shape: f32[196,512], index: 1, kind: input, shape index: {}]   ;;  %s4852_s0 = inlined_call_operand.vmem [shape: f32[16,196], index: 0, kind: input, shape index: {}]   ;;  %s4853_s2 = inlined_call_operand.vmem [shape: f32[16,1], index: 2, kind: input, shape index: {}]   ;;  %s4854_s3 = inlined_call_operand.vmem [shape: f32[16,512], index: 3, kind: output, shape index: {}]  }
   0x1   :  { %v78_v0 = vld [vmem:[%s4851_s1 + $0x1e0] sm:$0xff] }
   0x2   :  { %v74_v1 = vld [vmem:[%s4851_s1 + $0x1c0] sm:$0xff]  ;;  %v2814_v3 = vand.u32 4294901760, %v78_v0 }
   0x3   :  { %v70_v2 = vld [vmem:[%s4851_s1 + $0x1a0] sm:$0xff]  ;;  %v2816_v4 = vand.u32 4294901760, %v74_v1 }
   0x4   :  { %v2818_v5 = vand.u32 4294901760, %v70_v2  ;;  %v66_v6 = vld [vmem:[%s4851_s1 + $0x180] sm:$0xff]  ;;  %151 = vmatpush.msra.mxu0 %v2814_v3  ;;  %v2843_v14 = vsub.f32 %v78_v0, %v2814_v3  ;;  %364 = vmatpush.msra.mxu3 %v2814_v3 }
   0x5   :  { %v62_v7 = vld [vmem:[%s4851_s1 + $0x160] sm:$0xff]  ;;  %v2829_v9 = vand.u32 4294901760, %v66_v6  ;;  %v2846_v15 = vsub.f32 %v74_v1, %v2816_v4 }
   0x6   :  { %v58_v8 = vld [vmem:[%s4851_s1 + $0x140] sm:$0xff]  ;;  %v2831_v10 = vand.u32 4294901760, %v62_v7  ;;  %v2850_v16 = vsub.f32 %v70_v2, %v2818_v5  ;;  %153 = vmatpush.msra.mxu0 %v2816_v4  ;;  %306 = vmatpush.msra.mxu2 %v2843_v14  ;;  %v201_v23 = vand.u32 4294901760, %v2843_v14 }
   0x7   :  { %v2833_v11 = vand.u32 4294901760, %v58_v8  ;;  %v54_v12 = vld [vmem:[%s4851_s1 + $0x120] sm:$0xff]  ;;  %v2858_v19 = vsub.f32 %v66_v6, %v2829_v9  ;;  %v207_v24 = vand.u32 4294901760, %v2846_v15  ;;  %366 = vmatpush.msra.mxu3 %v2816_v4 }
   0x8   :  { %v50_v13 = vld [vmem:[%s4851_s1 + $0x100] sm:$0xff]  ;;  %v2852_v17 = vand.u32 4294901760, %v54_v12  ;;  %v2861_v20 = vsub.f32 %v62_v7, %v2831_v10  ;;  %v4870_v25 = vand.u32 4294901760, %v2850_v16  ;;  %155 = vmatpush.msra.mxu0 %v2818_v5  ;;  %309 = vmatpush.msra.mxu2 %v2846_v15  ;;  %v202_v30 = vsub.f32 %v2843_v14, %v201_v23 }
   0x9   :  { %v46_v18 = vld [vmem:[%s4851_s1 + $0xe0] sm:$0xff]  ;;  %v2864_v21 = vsub.f32 %v58_v8, %v2833_v11  ;;  %v2866_v22 = vand.u32 4294901760, %v50_v13  ;;  %v4869_v26 = vand.u32 4294901760, %v2858_v19  ;;  %v208_v31 = vsub.f32 %v2846_v15, %v207_v24  ;;  %368 = vmatpush.msra.mxu3 %v2818_v5 }
   0xa   :  { %v2876_v27 = vsub.f32 %v54_v12, %v2852_v17  ;;  %v2878_v28 = vand.u32 4294901760, %v46_v18  ;;  %v42_v29 = vld [vmem:[%s4851_s1 + $0xc0] sm:$0xff]  ;;  %v214_v32 = vsub.f32 %v2850_v16, %v4870_v25  ;;  %v4866_v33 = vand.u32 4294901760, %v2861_v20  ;;  %157 = vmatpush.msra.mxu0 %v2829_v9  ;;  %312 = vmatpush.msra.mxu2 %v2850_v16 }
   0xb   :  { %v2897_v34 = vsub.f32 %v50_v13, %v2866_v22  ;;  %v4864_v35 = vand.u32 4294901760, %v2864_v21  ;;  %v38_v36 = vld [vmem:[%s4851_s1 + $0xa0] sm:$0xff]  ;;  %v203_v37 = vand.u32 4294901760, %v202_v30  ;;  %v209_v38 = vand.u32 4294901760, %v208_v31  ;;  %370 = vmatpush.msra.mxu3 %v2829_v9 }
   0xc   :  { %v220_v39 = vsub.f32 %v2858_v19, %v4869_v26  ;;  %v2908_v40 = vand.u32 4294901760, %v42_v29  ;;  %v4863_v41 = vand.u32 4294901760, %v2876_v27  ;;  %v34_v42 = vld [vmem:[%s4851_s1 + $0x80] sm:$0xff]  ;;  %159 = vmatpush.msra.mxu0 %v2831_v10  ;;  %v215_v43 = vand.u32 4294901760, %v214_v32  ;;  %315 = vmatpush.msra.mxu2 %v2858_v19  ;;  %v15_v26 = vld [vmem:[%s4852_s0 + $0x8] sm:$0xff] }
   0xd   :  { %204 = vmatpush.msra.mxu1 %v203_v37  ;;  %v226_v44 = vsub.f32 %v2861_v20, %v4866_v33  ;;  %v2920_v45 = vsub.f32 %v46_v18, %v2878_v28  ;;  %v2922_v46 = vand.u32 4294901760, %v38_v36  ;;  %372 = vmatpush.msra.mxu3 %v2831_v10  ;;  %v232_v47 = vsub.f32 %v2864_v21, %v4864_v35  ;;  %v30_v49 = vld [vmem:[%s4851_s1 + $0x60] sm:$0xff] }
   0xe   :  { %v4861_v48 = vand.u32 4294901760, %v2897_v34  ;;  %161 = vmatpush.msra.mxu0 %v2833_v11  ;;  %v221_v50 = vand.u32 4294901760, %v220_v39  ;;  %v2935_v51 = vsub.f32 %v42_v29, %v2908_v40  ;;  %v2937_v52 = vand.u32 4294901760, %v34_v42  ;;  %318 = vmatpush.msra.mxu2 %v2861_v20  ;;  %v26_v54 = vld [vmem:[%s4851_s1 + $0x40] sm:$0xff] }
   0xf   :  { %210 = vmatpush.msra.mxu1 %v209_v38  ;;  %374 = vmatpush.msra.mxu3 %v2833_v11  ;;  %v238_v53 = vsub.f32 %v2876_v27, %v4863_v41  ;;  %v114_v55 = vld [vmem:[%s4851_s1 + $0x300] sm:$0xf]  ;;  %v227_v56 = vand.u32 4294901760, %v226_v44  ;;  %v2952_v57 = vsub.f32 %v38_v36, %v2922_v46  ;;  %v2954_v58 = vand.u32 4294901760, %v30_v49 }
  0x10   :  { %163 = vmatpush.msra.mxu0 %v2852_v17  ;;  %v4859_v59 = vand.u32 4294901760, %v2920_v45  ;;  %321 = vmatpush.msra.mxu2 %v2864_v21  ;;  %v233_v60 = vand.u32 4294901760, %v232_v47  ;;  %v244_v61 = vsub.f32 %v2897_v34, %v4861_v48  ;;  %v22_v62 = vld [vmem:[%s4851_s1 + $0x20] sm:$0xff]  ;;  %v2967_v63 = vsub.f32 %v34_v42, %v2937_v52 }
  0x11   :  { %216 = vmatpush.msra.mxu1 %v215_v43  ;;  %376 = vmatpush.msra.mxu3 %v2852_v17  ;;  %v2969_v0 = vand.u32 4294901760, %v26_v54  ;;  %v4858_v1 = vand.u32 4294901760, %v2935_v51  ;;  %v139_v2 = vsel %vm137_vm0, %v114_v55, 0  ;;  %v110_v6 = vld [vmem:[%s4851_s1 + $0x2e0] sm:$0xff]  ;;  %v239_v7 = vand.u32 4294901760, %v238_v53 }
  0x12   :  { %165 = vmatpush.msra.mxu0 %v2866_v22  ;;  %324 = vmatpush.msra.mxu2 %v2876_v27  ;;  %v18_v8 = vld [vmem:[%s4851_s1] sm:$0xff]  ;;  %v2981_v12 = vand.u32 4294901760, %v139_v2  ;;  %v250_v13 = vsub.f32 %v2920_v45, %v4859_v59  ;;  %v2988_v18 = vsub.f32 %v30_v49, %v2954_v58  ;;  %v2990_v29 = vand.u32 4294901760, %v22_v62 }
  0x13   :  { %222 = vmatpush.msra.mxu1 %v221_v50  ;;  %378 = vmatpush.msra.mxu3 %v2866_v22  ;;  %v4856_v30 = vand.u32 4294901760, %v2952_v57  ;;  %v245_v31 = vand.u32 4294901760, %v244_v61  ;;  %v2995_v32 = vand.u32 4294901760, %v110_v6  ;;  %v256_v36 = vsub.f32 %v2935_v51, %v4858_v1  ;;  %v106_v42 = vld [vmem:[%s4851_s1 + $0x2c0] sm:$0xff] }
  0x14   :  { %167 = vmatpush.msra.mxu0 %v2878_v28  ;;  %327 = vmatpush.msra.mxu2 %v2897_v34  ;;  %v3002_v37 = vsub.f32 %v26_v54, %v2969_v0  ;;  %v3004_v38 = vand.u32 4294901760, %v18_v8  ;;  %v4855_v39 = vand.u32 4294901760, %v2967_v63  ;;  %v3013_v43 = vsub.f32 %v139_v2, %v2981_v12  ;;  %v102_v53 = vld [vmem:[%s4851_s1 + $0x2a0] sm:$0xff] }
  0x15   :  { %228 = vmatpush.msra.mxu1 %v227_v56  ;;  %380 = vmatpush.msra.mxu3 %v2878_v28  ;;  %v251_v44 = vand.u32 4294901760, %v250_v13  ;;  %v262_v47 = vsub.f32 %v2952_v57, %v4856_v30  ;;  %v3020_v49 = vsub.f32 %v22_v62, %v2990_v29  ;;  %v4857_v50 = vand.u32 4294901760, %v2988_v18  ;;  %v98_v2 = vld [vmem:[%s4851_s1 + $0x280] sm:$0xff] }
  0x16   :  { %169 = vmatpush.msra.mxu0 %v2908_v40  ;;  %330 = vmatpush.msra.mxu2 %v2920_v45  ;;  %v3028_v54 = vand.u32 4294901760, %v106_v42  ;;  %v3031_v55 = vsub.f32 %v110_v6, %v2995_v32  ;;  %v257_v56 = vand.u32 4294901760, %v256_v36  ;;  %v3038_v61 = vsub.f32 %v18_v8, %v3004_v38  ;;  %v94_v36 = vld [vmem:[%s4851_s1 + $0x260] sm:$0xff] }
  0x17   :  { %234 = vmatpush.msra.mxu1 %v233_v60  ;;  %382 = vmatpush.msra.mxu3 %v2908_v40  ;;  %v268_v60 = vsub.f32 %v2967_v63, %v4855_v39  ;;  %v4860_v62 = vand.u32 4294901760, %v3002_v37  ;;  %v4862_v6 = vand.u32 4294901760, %v3013_v43  ;;  %v263_v13 = vand.u32 4294901760, %v262_v47  ;;  %v14_v59 = vld [vmem:[%s4852_s0] sm:$0xff] }
  0x18   :  { %171 = vmatpush.msra.mxu0 %v2922_v46  ;;  %333 = vmatpush.msra.mxu2 %v2935_v51  ;;  %v274_v8 = vsub.f32 %v2988_v18, %v4857_v50  ;;  %v4867_v39 = vand.u32 4294901760, %v3031_v55  ;;  %v3061_v30 = vsub.f32 %v106_v42, %v3028_v54  ;;  %v4868_v1 = vand.u32 4294901760, %v3038_v61  ;;  %v82_v25 = vld [vmem:[%s4851_s1 + $0x200] sm:$0xff] }
  0x19   :  { %240 = vmatpush.msra.mxu1 %v239_v7  ;;  %384 = vmatpush.msra.mxu3 %v2922_v46  ;;  %v3047_v7 = vand.u32 4294901760, %v102_v53  ;;  %v269_v47 = vand.u32 4294901760, %v268_v60  ;;  %v280_v50 = vsub.f32 %v3002_v37, %v4860_v62  ;;  %v574_v42 = vsub.f32 %v3013_v43, %v4862_v6  ;;  %v90_v62 = vld [vmem:[%s4851_s1 + $0x240] sm:$0xff] }
  0x1a   :  { %173 = vmatpush.msra.mxu0 %v2937_v52  ;;  %336 = vmatpush.msra.mxu2 %v2952_v57  ;;  %v3081_v60 = vand.u32 4294901760, %v94_v36  ;;  %v275_v48 = vand.u32 4294901760, %v274_v8  ;;  %v4871_v41 = vand.u32 4294901760, %v3061_v30  ;;  %v292_v8 = vsub.f32 %v3038_v61, %v4868_v1 }
  0x1b   :  { %246 = vmatpush.msra.mxu1 %v245_v31  ;;  %386 = vmatpush.msra.mxu3 %v2937_v52  ;;  %v4865_v31 = vand.u32 4294901760, %v3020_v49  ;;  %v3105_v33 = vand.u32 4294901760, %v90_v62  ;;  %v4937_v15 = vand.u32 4294901760, %v2850_v16  ;;  %v4939_v16 = vand.u32 4294901760, %v2858_v19 }
  0x1c   :  { %175 = vmatpush.msra.mxu0 %v2954_v58  ;;  %339 = vmatpush.msra.mxu2 %v2967_v63  ;;  %v4942_v19 = vand.u32 4294901760, %v2861_v20  ;;  %v4944_v20 = vand.u32 4294901760, %v2864_v21 }
  0x1d   :  { %252 = vmatpush.msra.mxu1 %v251_v44  ;;  %388 = vmatpush.msra.mxu3 %v2954_v58  ;;  %v3063_v44 = vand.u32 4294901760, %v98_v2  ;;  %v286_v6 = vsub.f32 %v3020_v49, %v4865_v31  ;;  %v3103_v31 = vand.u32 4294901760, %v14_v59 }
  0x1e   :  { %177 = vmatpush.msra.mxu0 %v2969_v0  ;;  %342 = vmatpush.msra.mxu2 %v2988_v18 }
  0x1f   :  { %258 = vmatpush.msra.mxu1 %v257_v56  ;;  %390 = vmatpush.msra.mxu3 %v2969_v0  ;;  %v3079_v56 = vsub.f32 %v102_v53, %v3047_v7  ;;  %v580_v53 = vsub.f32 %v3031_v55, %v4867_v39  ;;  %v3097_v35 = vsub.f32 %v98_v2, %v3063_v44  ;;  %v86_v39 = vld [vmem:[%s4851_s1 + $0x220] sm:$0xff]  ;;  %v575_v2 = vand.u32 4294901760, %v574_v42 }
  0x20   :  { %179 = vmatpush.msra.mxu0 %v2990_v29  ;;  %345 = vmatpush.msra.mxu2 %v3002_v37  ;;  %4936 = vst [vmem:[#allocation2_spill] sm:$0xff] %v3103_v31  ;;  %v287_v1 = vand.u32 4294901760, %v286_v6  ;;  %v3131_v6 = vand.u32 4294901760, %v86_v39  ;;  %v3135_v42 = vsub.f32 %v14_v59, %v3103_v31  ;;  %v16_v59 = vld [vmem:[%s4852_s0 + $0x10] sm:$0xff] }
  0x21   :  { %264 = vmatpush.msra.mxu1 %v263_v13  ;;  %392 = vmatpush.msra.mxu3 %v2990_v29  ;;  %v281_v13 = vand.u32 4294901760, %v280_v50  ;;  %v581_v14 = vand.u32 4294901760, %v580_v53  ;;  %v3138_v50 = vsub.f32 %v90_v62, %v3105_v33 }
  0x22   :  { %181 = vmatpush.msra.mxu0 %v3004_v38  ;;  %348 = vmatpush.msra.mxu2 %v3020_v49 }
  0x23   :  { %270 = vmatpush.msra.mxu1 %v269_v47  ;;  %v3115_v47 = vsub.f32 %v94_v36, %v3081_v60  ;;  %394 = vmatpush.msra.mxu3 %v3004_v38  ;;  %v293_v36 = vand.u32 4294901760, %v292_v8  ;;  %v4940_v8 = vand.u32 4294901760, %v3097_v35 }
  0x24   :  { %411 = vmatpush.msrb.mxu0 %v201_v23  ;;  %351 = vmatpush.msra.mxu2 %v3038_v61  ;;  %v586_v23 = vsub.f32 %v3061_v30, %v4871_v41 }
  0x25   :  { %276 = vmatpush.msra.mxu1 %v275_v48  ;;  %576 = vmatpush.msrb.mxu3 %v575_v2  ;;  %v603_v41 = vand.u32 4294901760, %v3115_v47  ;;  %v3146_v48 = vand.u32 4294901760, %v82_v25  ;;  %v598_v2 = vsub.f32 %v3097_v35, %v4940_v8 }
  0x26   :  { %415 = vmatpush.msrb.mxu0 %v207_v24  ;;  %530 = vmatpush.msrb.mxu2 %v2981_v12  ;;  %v4938_v24 = vand.u32 4294901760, %v3079_v56  ;;  %v587_v62 = vand.u32 4294901760, %v586_v23  ;;  %v3174_v23 = vand.u32 4294901760, %v16_v59 }
  0x27   :  { %282 = vmatpush.msra.mxu1 %v281_v13  ;;  %v132_v13 = vsel %vm130_vm1, %v15_v26, 0  ;;  %582 = vmatpush.msrb.mxu3 %v581_v14  ;;  %v3163_v26 = vand.u32 4294901760, %v3135_v42 }
  0x28   :  { %419 = vmatpush.msrb.mxu0 %v4937_v15  ;;  %v592_v53 = vsub.f32 %v3079_v56, %v4938_v24  ;;  %532 = vmatpush.msrb.mxu2 %v2995_v32  ;;  %v3159_v15 = vsub.f32 %v86_v39, %v3131_v6  ;;  %v3166_v24 = vand.u32 4294901760, %v132_v13  ;;  %v604_v39 = vsub.f32 %v3115_v47, %v603_v41 }
  0x29   :  { %288 = vmatpush.msra.mxu1 %v287_v1  ;;  %v609_v1 = vand.u32 4294901760, %v3138_v50  ;;  %354 = vmatmul.f32.vlgmr.msra.gmra.mxu2 %v3135_v42  ;;  %4943 = vst [vmem:[#allocation4_spill] sm:$0xff] %v3174_v23 }
  0x2a   :  { %423 = vmatpush.msrb.mxu0 %v4939_v16  ;;  %534 = vmatpush.msrb.mxu2 %v3028_v54  ;;  %4941 = vst [vmem:[#allocation3_spill] sm:$0xff] %v3166_v24  ;;  %v593_v14 = vand.u32 4294901760, %v592_v53  ;;  %v185_v16 = vsub.f32 %v3135_v42, %v3163_v26  ;;  %v599_v53 = vand.u32 4294901760, %v598_v2  ;;  %v615_v8 = vand.u32 4294901760, %v3159_v15 }
  0x2b   :  { %294 = vmatpush.msra.mxu1 %v293_v36  ;;  %v3177_v36 = vsub.f32 %v82_v25, %v3146_v48  ;;  %588 = vmatpush.msrb.mxu3 %v587_v62  ;;  %v3195_v25 = vsub.f32 %v132_v13, %v3166_v24  ;;  %v605_v21 = vand.u32 4294901760, %v604_v39  ;;  %v3199_v62 = vsub.f32 %v16_v59, %v3174_v23 }
  0x2c   :  { %427 = vmatpush.msrb.mxu0 %v4942_v19  ;;  %536 = vmatpush.msrb.mxu2 %v3047_v7  ;;  %v17_v19 = vld [vmem:[%s4852_s0 + $0x18] sm:$0xff]  ;;  %v616_v13 = vsub.f32 %v3159_v15, %v615_v8  ;;  %v4947_v59 = vand.u32 4294901760, %v2897_v34 }
  0x2d   :  { %482 = vmatpush.msrb.mxu1 %v2814_v3  ;;  %398 = vmatmul.f32.vlgmr.msra.gmra.mxu3 %v3163_v26  ;;  %v610_v3 = vsub.f32 %v3138_v50, %v609_v1  ;;  %4945 = vst [vmem:[#allocation5_spill] sm:$0xff] %v3195_v25  ;;  %v621_v2 = vand.u32 4294901760, %v3177_v36  ;;  %v3216_v39 = vand.u32 4294901760, %v3195_v25 }
  0x2e   :  { %431 = vmatpush.msrb.mxu0 %v4944_v20  ;;  %538 = vmatpush.msrb.mxu2 %v3063_v44  ;;  %v4946_v20 = vand.u32 4294901760, %v2876_v27 }
  0x2f   :  { %484 = vmatpush.msrb.mxu1 %v2816_v4  ;;  %594 = vmatpush.msrb.mxu3 %v593_v14  ;;  %v3205_v4 = vand.u32 4294901760, %v185_v16  ;;  %v135_v14 = vsel %vm130_vm1, %v17_v19, 0  ;;  %v611_v27 = vand.u32 4294901760, %v610_v3  ;;  %4948 = vst [vmem:[#allocation6_spill] sm:$0xff] %v3216_v39  ;;  %v622_v16 = vsub.f32 %v3177_v36, %v621_v2 }
  0x30   :  { %435 = vmatpush.msrb.mxu0 %v4946_v20  ;;  %540 = vmatpush.msrb.mxu2 %v3081_v60  ;;  %v3227_v34 = vand.u32 4294901760, %v135_v14  ;;  %v550_v3 = vsub.f32 %v3195_v25, %v3216_v39 }
  0x31   :  { %486 = vmatpush.msrb.mxu1 %v2818_v5  ;;  %600 = vmatpush.msrb.mxu3 %v599_v53  ;;  %v3220_v5 = vand.u32 4294901760, %v3199_v62  ;;  %v617_v53 = vand.u32 4294901760, %v616_v13  ;;  %v623_v20 = vand.u32 4294901760, %v622_v16  ;;  %v4954_v13 = vand.u32 4294901760, %v2952_v57  ;;  %v79_v57 = vld [vmem:[%s4851_s1 + $0x1e8] sm:$0xff] }
  0x32   :  { %439 = vmatpush.msrb.mxu0 %v4947_v59  ;;  %542 = vmatpush.msrb.mxu2 %v3105_v33  ;;  %4949 = vst [vmem:[#allocation7_spill] sm:$0xff] %v3227_v34  ;;  %v4958_v59 = vand.u32 4294901760, %v2988_v18  ;;  %v71_v18 = vld [vmem:[%s4851_s1 + $0x1a8] sm:$0xff] }
  0x33   :  { %488 = vmatpush.msrb.mxu1 %v2829_v9  ;;  %606 = vmatpush.msrb.mxu3 %v605_v21  ;;  %v4950_v9 = vand.u32 4294901760, %v2920_v45  ;;  %v193_v19 = vsub.f32 %v3199_v62, %v3220_v5  ;;  %v4951_v21 = vand.u32 4294901760, %v2935_v51  ;;  %v3251_v51 = vand.u32 4294901760, %v550_v3  ;;  %v63_v3 = vld [vmem:[%s4851_s1 + $0x168] sm:$0xff] }
  0x34   :  { %187 = vmatmul.f32.vlgmr.msra.gmra.mxu0 %v3205_v4  ;;  %359 = vmatmul.f32.gmra.mxu2 %v3199_v62 }
  0x35   :  { %443 = vmatpush.msrb.mxu0 %v4950_v9  ;;  %490 = vmatpush.msrb.mxu1 %v2831_v10  ;;  %v3243_v10 = vsub.f32 %v135_v14, %v3227_v34  ;;  %v3246_v45 = vand.u32 4294901760, %v193_v19  ;;  %4955 = vst [vmem:[#allocation10_spill] sm:$0xff] %v3251_v51  ;;  %v4960_v9 = vand.u32 4294901760, %v3020_v49  ;;  %v4962_v19 = vand.u32 4294901760, %v3038_v61 }
  0x36   :  { %544 = vmatpush.msrb.mxu2 %v3131_v6  ;;  %612 = vmatpush.msrb.mxu3 %v611_v27  ;;  %v4959_v27 = vand.u32 4294901760, %v3002_v37 }
  0x37   :  { %404 = vmatmul.f32.gmra.mxu3 %v3220_v5  ;;  %447 = vmatpush.msrb.mxu0 %v4951_v21  ;;  %4952 = vst [vmem:[#allocation8_spill] sm:$0xff] %v3243_v10  ;;  %v3258_v14 = vand.u32 4294901760, %v3243_v10 }
  0x38   :  { %492 = vmatpush.msrb.mxu1 %v2833_v11  ;;  %546 = vmatpush.msrb.mxu2 %v3146_v48  ;;  %4953 = vst [vmem:[#allocation9_spill] sm:$0xff] %v3246_v45  ;;  %v4956_v11 = vand.u32 4294901760, %v2967_v63  ;;  %v75_v63 = vld [vmem:[%s4851_s1 + $0x1c8] sm:$0xff] }
  0x39   :  { %618 = vmatpush.msrb.mxu3 %v617_v53  ;;  %451 = vmatpush.msrb.mxu0 %v4954_v13  ;;  %4957 = vst [vmem:[#allocation11_spill] sm:$0xff] %v3258_v14  ;;  %v3284_v16 = vand.u32 4294901760, %v75_v63  ;;  %v67_v53 = vld [vmem:[%s4851_s1 + $0x188] sm:$0xff]  ;;  %v4963_v13 = vand.u32 4294901760, %v3013_v43 }
  0x3a   :  { %643 = vmatpush.msra.mxu2 %v3013_v43  ;;  %494 = vmatpush.msrb.mxu1 %v2852_v17  ;;  %v3269_v17 = vand.u32 4294901760, %v79_v57  ;;  %v3318_v21 = vand.u32 4294901760, %v67_v53  ;;  %v55_v43 = vld [vmem:[%s4851_s1 + $0x128] sm:$0xff] }
  0x3b   :  { %624 = vmatpush.msrb.mxu3 %v623_v20  ;;  %455 = vmatpush.msrb.mxu0 %v4956_v11  ;;  %v3310_v49 = vsub.f32 %v75_v63, %v3284_v16  ;;  %v3327_v20 = vand.u32 4294901760, %v63_v3  ;;  %v118_v11 = vld [vmem:[%s4853_s2] sm:$0xff]  ;;  %v2784_v63 = vmov 0  }
  0x3c   :  { %646 = vmatpush.msra.mxu2 %v3031_v55  ;;  %496 = vmatpush.msrb.mxu1 %v2866_v22  ;;  %v558_v22 = vsub.f32 %v3243_v10, %v3258_v14 }
  0x3d   :  { %687 = vmatpush.msra.mxu3 %v2981_v12  ;;  %195 = vmatmul.f32.gmra.mxu0 %v3246_v45 }
  0x3e   :  { %296 = vmatmul.f32.vlgmr.msra.gmra.mxu1 %v3103_v31  ;;  %552 = vmatmul.f32.vlgmr.msrb.gmra.mxu2 %v3251_v51  ;;  %v3297_v37 = vand.u32 4294901760, %v558_v22  ;;  %v3344_v22 = vsub.f32 %v67_v53, %v3318_v21 }
  0x3f   :  { %649 = vmatpush.msra.mxu2 %v3061_v30  ;;  %689 = vmatpush.msra.mxu3 %v2995_v32 }
  0x40   :  { %459 = vmatpush.msrb.mxu0 %v4958_v59  ;;  %498 = vmatpush.msrb.mxu1 %v2878_v28  ;;  %v3292_v28 = vsub.f32 %v79_v57, %v3269_v17  ;;  %4961 = vst [vmem:[#allocation12_spill] sm:$0xff] %v3297_v37  ;;  %v4874_v57 = vand.u32 4294901760, %v3310_v49 }
  0x41   :  { %626 = vmatmul.f32.vlgmr.msrb.gmra.mxu3 %v3166_v24  ;;  %652 = vmatpush.msra.mxu2 %v3079_v56 }
  0x42   :  { %691 = vmatpush.msra.mxu3 %v3028_v54  ;;  %463 = vmatpush.msrb.mxu0 %v4959_v27  ;;  %v4964_v27 = vand.u32 4294901760, %v3031_v55  ;;  %v861_v53 = vsub.f32 %v3310_v49, %v4874_v57  ;;  %v4965_v55 = vand.u32 4294901760, %v3061_v30  ;;  %v4966_v30 = vand.u32 4294901760, %v3079_v56  ;;  %v39_v57 = vld [vmem:[%s4851_s1 + $0xa8] sm:$0xff] }
  0x43   :  { %500 = vmatpush.msrb.mxu1 %v2908_v40  ;;  %655 = vmatpush.msra.mxu2 %v3097_v35  ;;  %v3304_v40 = vand.u32 4294901760, %v71_v18 }
  0x44   :  { %693 = vmatpush.msra.mxu3 %v3047_v7  ;;  %467 = vmatpush.msrb.mxu0 %v4960_v9  ;;  %v3357_v9 = vsub.f32 %v63_v3, %v3327_v20  ;;  %v4873_v3 = vand.u32 4294901760, %v3344_v22 }
  0x45   :  { %502 = vmatpush.msrb.mxu1 %v2922_v46  ;;  %658 = vmatpush.msra.mxu2 %v3115_v47  ;;  %v854_v46 = vand.u32 4294901760, %v3292_v28  ;;  %v3325_v61 = vsub.f32 %v71_v18, %v3304_v40  ;;  %v3440_v47 = vand.u32 4294901760, %v39_v57 }
  0x46   :  { %695 = vmatpush.msra.mxu3 %v3063_v44  ;;  %471 = vmatpush.msrb.mxu0 %v4962_v19  ;;  %v51_v19 = vld [vmem:[%s4851_s1 + $0x108] sm:$0xff]  ;;  %v873_v56 = vsub.f32 %v3344_v22, %v4873_v3 }
  0x47   :  { %504 = vmatpush.msrb.mxu1 %v2937_v52  ;;  %473 = vmatmul.f32.vlgmr.msrb.gmra.mxu0 %v3103_v31  ;;  %v59_v52 = vld [vmem:[%s4851_s1 + $0x148] sm:$0xff]  ;;  %v855_v59 = vsub.f32 %v3292_v28, %v854_v46  ;;  %v4872_v18 = vand.u32 4294901760, %v3325_v61 }
  0x48   :  { %300 = vmatmul.f32.gmra.mxu1 %v3174_v23  ;;  %560 = vmatmul.f32.gmra.mxu2 %v3297_v37 }
  0x49   :  { %661 = vmatpush.msra.mxu2 %v3138_v50  ;;  %697 = vmatpush.msra.mxu3 %v3081_v60  ;;  %v3463_v50 = vsub.f32 %v39_v57, %v3440_v47  ;;  %v23_v57 = vld [vmem:[%s4851_s1 + $0x28] sm:$0xff] }
  0x4a   :  { %727 = vmatpush.msra.mxu0 %v4963_v13  ;;  %506 = vmatpush.msrb.mxu1 %v2954_v58  ;;  %v3348_v58 = vand.u32 4294901760, %v59_v52  ;;  %v856_v13 = vand.u32 4294901760, %v855_v59  ;;  %v867_v59 = vsub.f32 %v3325_v61, %v4872_v18  ;;  %v43_v18 = vld [vmem:[%s4851_s1 + $0xc8] sm:$0xff] }
  0x4b   :  { %2783 = vset.pattern.permute.xlu0 %v2784_v63  ;;  %630 = vmatmul.f32.gmra.mxu3 %v3227_v34  ;;  %v47_v63 = vld [vmem:[%s4851_s1 + $0xe8] sm:$0xff] }
  0x4c   :  { %664 = vmatpush.msra.mxu2 %v3159_v15  ;;  %699 = vmatpush.msra.mxu3 %v3105_v33 }
  0x4d   :  { %731 = vmatpush.msra.mxu0 %v4964_v27  ;;  %122 = vperm.xlu0 %2783, %v118_v11   ;;  %v3371_v11 = vand.u32 4294901760, %v55_v43  ;;  %v3388_v27 = vand.u32 4294901760, %v51_v19 }
  0x4e   :  { %508 = vmatpush.msrb.mxu1 %v2969_v0  ;;  %667 = vmatpush.msra.mxu2 %v3177_v36  ;;  %v3376_v0 = vsub.f32 %v59_v52, %v3348_v58  ;;  %v862_v52 = vand.u32 4294901760, %v861_v53  ;;  %v19_v36 = vld [vmem:[%s4851_s1 + $0x8] sm:$0xff] }
  0x4f   :  { %701 = vmatpush.msra.mxu3 %v3131_v6  ;;  %735 = vmatpush.msra.mxu0 %v4965_v55  ;;  %v3397_v55 = vsub.f32 %v55_v43, %v3371_v11  ;;  %v3414_v3 = vsub.f32 %v51_v19, %v3388_v27  ;;  %v874_v19 = vand.u32 4294901760, %v873_v56  ;;  %v31_v56 = vld [vmem:[%s4851_s1 + $0x68] sm:$0xff] }
  0x50   :  { %510 = vmatpush.msrb.mxu1 %v2990_v29  ;;  %804 = vmatpush.msrb.mxu2 %v3269_v17  ;;  %v4875_v29 = vand.u32 4294901760, %v3357_v9  ;;  %v4876_v53 = vand.u32 4294901760, %v3376_v0 }
  0x51   :  { %703 = vmatpush.msra.mxu3 %v3146_v48  ;;  %739 = vmatpush.msra.mxu0 %v4966_v30  ;;  %v3399_v30 = vand.u32 4294901760, %v47_v63 }
  0x52   :  { %512 = vmatpush.msrb.mxu1 %v3004_v38  ;;  %806 = vmatpush.msrb.mxu2 %v3284_v16  ;;  %v4967_v38 = vand.u32 4294901760, %v3097_v35  ;;  %v879_v43 = vsub.f32 %v3357_v9, %v4875_v29  ;;  %v119_v35 = vld [vmem:[%s4853_s2 + $0x8] sm:$0xff]  ;;  %v885_v29 = vsub.f32 %v3376_v0, %v4876_v53 }
  0x53   :  { %857 = vmatpush.msrb.mxu3 %v856_v13  ;;  %514 = vmatmul.f32.vlgmr.msrb.gmra.mxu1 %v3103_v31  ;;  %v868_v13 = vand.u32 4294901760, %v867_v59  ;;  %v890_v59 = vand.u32 4294901760, %v3397_v55 }
  0x54   :  { %670 = vmatmul.f32.vlgmr.msra.gmra.mxu2 %v3195_v25  ;;  %743 = vmatpush.msra.mxu0 %v4967_v38  ;;  %v3430_v38 = vsub.f32 %v47_v63, %v3399_v30  ;;  %v896_v63 = vand.u32 4294901760, %v3414_v3 }
  0x55   :  { %777 = vmatpush.msra.mxu1 %v2981_v12  ;;  %477 = vmatmul.f32.gmra.mxu0 %v3174_v23  ;;  %v3423_v12 = vand.u32 4294901760, %v43_v18 }
  0x56   :  { %808 = vmatpush.msrb.mxu2 %v3304_v40  ;;  %863 = vmatpush.msrb.mxu3 %v862_v52  ;;  %v35_v52 = vld [vmem:[%s4851_s1 + $0x88] sm:$0xff]  ;;  %v897_v15 = vsub.f32 %v3414_v3, %v896_v63 }
  0x57   :  { %707 = vmatmul.f32.vlgmr.msra.gmra.mxu3 %v3216_v39  ;;  %747 = vmatpush.msra.mxu0 %v603_v41  ;;  %v880_v41 = vand.u32 4294901760, %v879_v43  ;;  %v3452_v53 = vand.u32 4294901760, %v35_v52  ;;  %v4877_v43 = vand.u32 4294901760, %v3430_v38 }
  0x58   :  { %779 = vmatpush.msra.mxu1 %v2995_v32  ;;  %810 = vmatpush.msrb.mxu2 %v3318_v21  ;;  %v3450_v32 = vsub.f32 %v43_v18, %v3423_v12  ;;  %v27_v18 = vld [vmem:[%s4851_s1 + $0x48] sm:$0xff] }
  0x59   :  { %869 = vmatpush.msrb.mxu3 %v868_v13  ;;  %127 = vperm.xlu0 %2783, %v119_v35   ;;  %v891_v13 = vsub.f32 %v3397_v55, %v890_v59  ;;  %v903_v35 = vsub.f32 %v3430_v38, %v4877_v43 }
  0x5a   :  { %751 = vmatpush.msra.mxu0 %v609_v1  ;;  %781 = vmatpush.msra.mxu1 %v3028_v54  ;;  %v886_v54 = vand.u32 4294901760, %v885_v29  ;;  %v3465_v1 = vand.u32 4294901760, %v31_v56 }
  0x5b   :  { %812 = vmatpush.msrb.mxu2 %v3327_v20  ;;  %875 = vmatpush.msrb.mxu3 %v874_v19  ;;  %v892_v29 = vand.u32 4294901760, %v891_v13  ;;  %v3489_v19 = vand.u32 4294901760, %v27_v18 }
  0x5c   :  { %755 = vmatpush.msra.mxu0 %v615_v8  ;;  %783 = vmatpush.msra.mxu1 %v3047_v7  ;;  %v4878_v7 = vand.u32 4294901760, %v3450_v32  ;;  %v3478_v8 = vsub.f32 %v35_v52, %v3452_v53  ;;  %v4879_v52 = vand.u32 4294901760, %v3463_v50 }
  0x5d   :  { %814 = vmatpush.msrb.mxu2 %v3348_v58  ;;  %881 = vmatpush.msrb.mxu3 %v880_v41  ;;  %v3494_v41 = vsub.f32 %v31_v56, %v3465_v1  ;;  %v3511_v43 = vsub.f32 %v27_v18, %v3489_v19 }
  0x5e   :  { %518 = vmatmul.f32.gmra.mxu1 %v3174_v23  ;;  %675 = vmatmul.f32.gmra.mxu2 %v3243_v10  ;;  %v909_v56 = vsub.f32 %v3450_v32, %v4878_v7  ;;  %v920_v13 = vand.u32 4294901760, %v3478_v8 }
  0x5f   :  { %759 = vmatpush.msra.mxu0 %v621_v2  ;;  %785 = vmatpush.msra.mxu1 %v3063_v44  ;;  %v898_v44 = vand.u32 4294901760, %v897_v15  ;;  %v3501_v2 = vand.u32 4294901760, %v23_v57  ;;  %v3513_v15 = vand.u32 4294901760, %v19_v36  ;;  %v926_v7 = vand.u32 4294901760, %v3494_v41 }
  0x60   :  { %816 = vmatpush.msrb.mxu2 %v3371_v11  ;;  %887 = vmatpush.msrb.mxu3 %v886_v54  ;;  %v904_v54 = vand.u32 4294901760, %v903_v35  ;;  %v910_v18 = vand.u32 4294901760, %v909_v56  ;;  %v932_v35 = vand.u32 4294901760, %v3511_v43 }
  0x61   :  { %959 = vmatpush.msrb.mxu0 %v3292_v28  ;;  %713 = vmatmul.f32.gmra.mxu3 %v3258_v14  ;;  %v111_v28 = vld [vmem:[%s4851_s1 + $0x2e8] sm:$0xff] }
  0x62   :  { %761 = vmatmul.f32.vlgmr.msra.gmra.mxu0 %v3166_v24  ;;  %787 = vmatpush.msra.mxu1 %v3081_v60  ;;  %v915_v60 = vsub.f32 %v3463_v50, %v4879_v52  ;;  %v3533_v52 = vsub.f32 %v19_v36, %v3513_v15 }
  0x63   :  { %818 = vmatpush.msrb.mxu2 %v3388_v27  ;;  %893 = vmatpush.msrb.mxu3 %v892_v29  ;;  %v3523_v29 = vsub.f32 %v23_v57, %v3501_v2 }
  0x64   :  { %962 = vmatpush.msrb.mxu0 %v3310_v49  ;;  %789 = vmatpush.msra.mxu1 %v3105_v33  ;;  %v921_v33 = vsub.f32 %v3478_v8, %v920_v13  ;;  %v916_v57 = vand.u32 4294901760, %v915_v60  ;;  %v944_v56 = vand.u32 4294901760, %v3533_v52 }
  0x65   :  { %820 = vmatpush.msrb.mxu2 %v3399_v30  ;;  %899 = vmatpush.msrb.mxu3 %v898_v44  ;;  %v938_v44 = vand.u32 4294901760, %v3523_v29 }
  0x66   :  { %965 = vmatpush.msrb.mxu0 %v3325_v61  ;;  %791 = vmatpush.msra.mxu1 %v3131_v6  ;;  %v927_v6 = vsub.f32 %v3494_v41, %v926_v7  ;;  %v922_v36 = vand.u32 4294901760, %v921_v33  ;;  %v945_v33 = vsub.f32 %v3533_v52, %v944_v56 }
  0x67   :  { %822 = vmatpush.msrb.mxu2 %v3423_v12  ;;  %905 = vmatpush.msrb.mxu3 %v904_v54  ;;  %v939_v60 = vsub.f32 %v3523_v29, %v938_v44 }
  0x68   :  { %968 = vmatpush.msrb.mxu0 %v3344_v22  ;;  %793 = vmatpush.msra.mxu1 %v3146_v48  ;;  %v933_v48 = vsub.f32 %v3511_v43, %v932_v35  ;;  %v928_v54 = vand.u32 4294901760, %v927_v6  ;;  %v946_v6 = vand.u32 4294901760, %v945_v33 }
  0x69   :  { %795 = vmatmul.f32.vlgmr.msra.gmra.mxu1 %v3166_v24  ;;  %824 = vmatpush.msrb.mxu2 %v3440_v47 }
  0x6a   :  { %911 = vmatpush.msrb.mxu3 %v910_v18  ;;  %971 = vmatpush.msrb.mxu0 %v3357_v9  ;;  %v934_v18 = vand.u32 4294901760, %v933_v48 }
  0x6b   :  { %1017 = vmatpush.msrb.mxu1 %v3269_v17  ;;  %765 = vmatmul.f32.gmra.mxu0 %v3227_v34 }
  0x6c   :  { %826 = vmatpush.msrb.mxu2 %v3452_v53  ;;  %917 = vmatpush.msrb.mxu3 %v916_v57  ;;  %v940_v57 = vand.u32 4294901760, %v939_v60 }
  0x6d   :  { %974 = vmatpush.msrb.mxu0 %v3376_v0  ;;  %1019 = vmatpush.msrb.mxu1 %v3284_v16 }
  0x6e   :  { %828 = vmatpush.msrb.mxu2 %v3465_v1  ;;  %923 = vmatpush.msrb.mxu3 %v922_v36  ;;  %v115_v36 = vld [vmem:[%s4851_s1 + $0x308] sm:$0xf] }
  0x6f   :  { %977 = vmatpush.msrb.mxu0 %v3397_v55  ;;  %1021 = vmatpush.msrb.mxu1 %v3304_v40  ;;  %v142_v48 = vsel %vm137_vm0, %v115_v36, 0 }
  0x70   :  { %830 = vmatpush.msrb.mxu2 %v3489_v19  ;;  %929 = vmatpush.msrb.mxu3 %v928_v54  ;;  %v4968_v54 = vand.u32 4294901760, %v3310_v49  ;;  %v3584_v60 = vand.u32 4294901760, %v142_v48  ;;  %v4970_v49 = vand.u32 4294901760, %v3344_v22  ;;  %v103_v22 = vld [vmem:[%s4851_s1 + $0x2a8] sm:$0xff] }
  0x71   :  { %980 = vmatpush.msrb.mxu0 %v3414_v3  ;;  %1023 = vmatpush.msrb.mxu1 %v3318_v21 }
  0x72   :  { %799 = vmatmul.f32.gmra.mxu1 %v3227_v34  ;;  %832 = vmatpush.msrb.mxu2 %v3501_v2 }
  0x73   :  { %935 = vmatpush.msrb.mxu3 %v934_v18  ;;  %983 = vmatpush.msrb.mxu0 %v3430_v38  ;;  %v3600_v18 = vand.u32 4294901760, %v111_v28 }
  0x74   :  { %1025 = vmatpush.msrb.mxu1 %v3327_v20  ;;  %834 = vmatpush.msrb.mxu2 %v3513_v15 }
  0x75   :  { %941 = vmatpush.msrb.mxu3 %v940_v57  ;;  %986 = vmatpush.msrb.mxu0 %v3450_v32  ;;  %v3624_v57 = vsub.f32 %v111_v28, %v3600_v18 }
  0x76   :  { %1027 = vmatpush.msrb.mxu1 %v3348_v58  ;;  %1064 = vmatpush.msra.mxu2 %v854_v46  ;;  %v4969_v46 = vand.u32 4294901760, %v3325_v61  ;;  %v3605_v61 = vsub.f32 %v142_v48, %v3584_v60 }
  0x77   :  { %947 = vmatpush.msrb.mxu3 %v946_v6  ;;  %989 = vmatpush.msrb.mxu0 %v3463_v50  ;;  %v3628_v6 = vand.u32 4294901760, %v103_v22  ;;  %v1232_v55 = vand.u32 4294901760, %v3624_v57 }
  0x78   :  { %1029 = vmatpush.msrb.mxu1 %v3371_v11  ;;  %1068 = vmatpush.msra.mxu2 %v4968_v54 }
  0x79   :  { %1135 = vmatpush.msra.mxu3 %v3269_v17  ;;  %992 = vmatpush.msrb.mxu0 %v3478_v8  ;;  %v107_v17 = vld [vmem:[%s4851_s1 + $0x2c8] sm:$0xff]  ;;  %v3657_v48 = vsub.f32 %v103_v22, %v3628_v6  ;;  %v1233_v28 = vsub.f32 %v3624_v57, %v1232_v55 }
  0x7a   :  { %1031 = vmatpush.msrb.mxu1 %v3388_v27  ;;  %1072 = vmatpush.msra.mxu2 %v4969_v46  ;;  %v3610_v33 = vand.u32 4294901760, %v107_v17  ;;  %v83_v22 = vld [vmem:[%s4851_s1 + $0x208] sm:$0xff] }
  0x7b   :  { %1137 = vmatpush.msra.mxu3 %v3284_v16  ;;  %995 = vmatpush.msrb.mxu0 %v3494_v41  ;;  %v4971_v16 = vand.u32 4294901760, %v3357_v9  ;;  %v99_v9 = vld [vmem:[%s4851_s1 + $0x288] sm:$0xff] }
  0x7c   :  { %1033 = vmatpush.msrb.mxu1 %v3399_v30  ;;  %1076 = vmatpush.msra.mxu2 %v4970_v49  ;;  %v3639_v36 = vand.u32 4294901760, %v99_v9  ;;  %v1244_v49 = vand.u32 4294901760, %v3657_v48 }
  0x7d   :  { %1139 = vmatpush.msra.mxu3 %v3304_v40  ;;  %998 = vmatpush.msrb.mxu0 %v3511_v43  ;;  %v4972_v40 = vand.u32 4294901760, %v3376_v0  ;;  %v3635_v0 = vsub.f32 %v107_v17, %v3610_v33 }
  0x7e   :  { %1035 = vmatpush.msrb.mxu1 %v3423_v12  ;;  %1080 = vmatpush.msra.mxu2 %v4971_v16  ;;  %v3668_v54 = vsub.f32 %v99_v9, %v3639_v36  ;;  %v4975_v9 = vand.u32 4294901760, %v3463_v50 }
  0x7f   :  { %1141 = vmatpush.msra.mxu3 %v3318_v21  ;;  %1001 = vmatpush.msrb.mxu0 %v3523_v29  ;;  %v1226_v21 = vand.u32 4294901760, %v3605_v61 }
  0x80   :  { %1037 = vmatpush.msrb.mxu1 %v3440_v47  ;;  %1084 = vmatpush.msra.mxu2 %v4972_v40 }
  0x81   :  { %1143 = vmatpush.msra.mxu3 %v3327_v20  ;;  %1004 = vmatpush.msrb.mxu0 %v3533_v52  ;;  %v95_v20 = vld [vmem:[%s4851_s1 + $0x268] sm:$0xff] }
  0x82   :  { %1039 = vmatpush.msrb.mxu1 %v3452_v53  ;;  %1088 = vmatpush.msra.mxu2 %v890_v59  ;;  %v91_v59 = vld [vmem:[%s4851_s1 + $0x248] sm:$0xff]  ;;  %v3661_v3 = vand.u32 4294901760, %v95_v20 }
  0x83   :  { %1145 = vmatpush.msra.mxu3 %v3348_v58  ;;  %1183 = vmatpush.msra.mxu0 %v3584_v60  ;;  %v1227_v58 = vsub.f32 %v3605_v61, %v1226_v21  ;;  %v3675_v46 = vand.u32 4294901760, %v91_v59 }
  0x84   :  { %1041 = vmatpush.msrb.mxu1 %v3465_v1  ;;  %1092 = vmatpush.msra.mxu2 %v896_v63  ;;  %v4973_v63 = vand.u32 4294901760, %v3430_v38  ;;  %v87_v38 = vld [vmem:[%s4851_s1 + $0x228] sm:$0xff]  ;;  %v3693_v40 = vsub.f32 %v95_v20, %v3661_v3  ;;  %v1245_v20 = vsub.f32 %v3657_v48, %v1244_v49 }
  0x85   :  { %1147 = vmatpush.msra.mxu3 %v3371_v11  ;;  %1185 = vmatpush.msra.mxu0 %v3600_v18  ;;  %v1238_v11 = vand.u32 4294901760, %v3635_v0  ;;  %v1228_v17 = vand.u32 4294901760, %v1227_v58  ;;  %v1234_v58 = vand.u32 4294901760, %v1233_v28 }
  0x86   :  { %1007 = vmatmul.f32.vlgmr.msrb.gmra.mxu0 %v3135_v42  ;;  %1043 = vmatpush.msrb.mxu1 %v3489_v19 }
  0x87   :  { %1096 = vmatpush.msra.mxu2 %v4973_v63  ;;  %1149 = vmatpush.msra.mxu3 %v3388_v27  ;;  %v4974_v27 = vand.u32 4294901760, %v3450_v32  ;;  %v1239_v16 = vsub.f32 %v3635_v0, %v1238_v11  ;;  %v3697_v32 = vand.u32 4294901760, %v87_v38  ;;  %v3704_v63 = vsub.f32 %v91_v59, %v3675_v46 }
  0x88   :  { %1187 = vmatpush.msra.mxu0 %v3610_v33  ;;  %840 = vmatmul.f32.vlgmr.msrb.gmra.mxu2 %v3205_v4 }
  0x89   :  { %1045 = vmatpush.msrb.mxu1 %v3501_v2  ;;  %1100 = vmatpush.msra.mxu2 %v4974_v27  ;;  %v3710_v27 = vand.u32 4294901760, %v83_v22  ;;  %v1240_v50 = vand.u32 4294901760, %v1239_v16  ;;  %v3722_v28 = vsub.f32 %v87_v38, %v3697_v32  ;;  %v1262_v8 = vand.u32 4294901760, %v3704_v63 }
  0x8a   :  { %1151 = vmatpush.msra.mxu3 %v3399_v30  ;;  %1189 = vmatpush.msra.mxu0 %v3628_v6  ;;  %v1250_v30 = vand.u32 4294901760, %v3668_v54 }
  0x8b   :  { %949 = vmatmul.f32.vlgmr.msrb.gmra.mxu3 %v3103_v31  ;;  %1047 = vmatpush.msrb.mxu1 %v3513_v15 }
  0x8c   :  { %1104 = vmatpush.msra.mxu2 %v4975_v9  ;;  %1153 = vmatpush.msra.mxu3 %v3423_v12  ;;  %v1256_v12 = vand.u32 4294901760, %v3693_v40  ;;  %v1251_v59 = vsub.f32 %v3668_v54, %v1250_v30 }
  0x8d   :  { %1191 = vmatpush.msra.mxu0 %v3639_v36  ;;  %1229 = vmatpush.msra.mxu1 %v1228_v17 }
  0x8e   :  { %1051 = vmatmul.f32.vlgmr.msrb.gmra.mxu1 %v3163_v26  ;;  %1108 = vmatpush.msra.mxu2 %v920_v13  ;;  %v3730_v13 = vsub.f32 %v83_v22, %v3710_v27  ;;  %v1257_v38 = vsub.f32 %v3693_v40, %v1256_v12  ;;  %v1252_v17 = vand.u32 4294901760, %v1251_v59  ;;  %v52_v22 = vld [vmem:[%s4851_s1 + $0x110] sm:$0xff] }
  0x8f   :  { %1155 = vmatpush.msra.mxu3 %v3440_v47  ;;  %1193 = vmatpush.msra.mxu0 %v3661_v3  ;;  %v1246_v47 = vand.u32 4294901760, %v1245_v20 }
  0x90   :  { %1235 = vmatpush.msra.mxu1 %v1234_v58  ;;  %1012 = vmatmul.f32.gmra.mxu0 %v3199_v62  ;;  %v1274_v41 = vand.u32 4294901760, %v3730_v13 }
  0x91   :  { %1112 = vmatpush.msra.mxu2 %v926_v7  ;;  %1157 = vmatpush.msra.mxu3 %v3452_v53  ;;  %v1268_v7 = vand.u32 4294901760, %v3722_v28  ;;  %v1263_v53 = vsub.f32 %v3704_v63, %v1262_v8 }
  0x92   :  { %1195 = vmatpush.msra.mxu0 %v3675_v46  ;;  %1241 = vmatpush.msra.mxu1 %v1240_v50  ;;  %v48_v50 = vld [vmem:[%s4851_s1 + $0xf0] sm:$0xff] }
  0x93   :  { %848 = vmatmul.f32.gmra.mxu2 %v3246_v45  ;;  %1159 = vmatpush.msra.mxu3 %v3465_v1  ;;  %v1258_v1 = vand.u32 4294901760, %v1257_v38  ;;  %v1269_v43 = vsub.f32 %v3722_v28, %v1268_v7  ;;  %v3911_v38 = vand.u32 4294901760, %v48_v50 }
  0x94   :  { %1116 = vmatpush.msra.mxu2 %v932_v35  ;;  %1197 = vmatpush.msra.mxu0 %v3697_v32  ;;  %v1264_v35 = vand.u32 4294901760, %v1263_v53 }
  0x95   :  { %1247 = vmatpush.msra.mxu1 %v1246_v47  ;;  %953 = vmatmul.f32.gmra.mxu3 %v3174_v23  ;;  %v1270_v29 = vand.u32 4294901760, %v1269_v43  ;;  %4977 = vst [vmem:[#allocation14_spill] sm:$0xff] %v3911_v38 }
  0x96   :  { %1120 = vmatpush.msra.mxu2 %v938_v44  ;;  %1161 = vmatpush.msra.mxu3 %v3489_v19  ;;  %v1275_v19 = vsub.f32 %v3730_v13, %v1274_v41 }
  0x97   :  { %1199 = vmatpush.msra.mxu0 %v3710_v27  ;;  %1253 = vmatpush.msra.mxu1 %v1252_v17 }
  0x98   :  { %1057 = vmatmul.f32.gmra.mxu1 %v3220_v5  ;;  %1124 = vmatpush.msra.mxu2 %v944_v56  ;;  %v1276_v52 = vand.u32 4294901760, %v1275_v19 }
  0x99   :  { %1296 = vmatpush.msrb.mxu0 %v3605_v61  ;;  %1163 = vmatpush.msra.mxu3 %v3501_v2  ;;  %v80_v2 = vld [vmem:[%s4851_s1 + $0x1f0] sm:$0xff] }
  0x9a   :  { %1259 = vmatpush.msra.mxu1 %v1258_v1  ;;  %1205 = vmatmul.f32.vlgmr.msra.gmra.mxu0 %v3251_v51  ;;  %v3792_v44 = vand.u32 4294901760, %v80_v2  ;;  %v68_v61 = vld [vmem:[%s4851_s1 + $0x190] sm:$0xff] }
  0x9b   :  { %1299 = vmatpush.msrb.mxu0 %v3624_v57  ;;  %1380 = vmatpush.msrb.mxu2 %v1226_v21  ;;  %v3827_v21 = vand.u32 4294901760, %v68_v61 }
  0x9c   :  { %1165 = vmatpush.msra.mxu3 %v3513_v15  ;;  %1265 = vmatpush.msra.mxu1 %v1264_v35  ;;  %v76_v15 = vld [vmem:[%s4851_s1 + $0x1d0] sm:$0xff] }
  0x9d   :  { %1126 = vmatmul.f32.vlgmr.msra.gmra.mxu2 %v3103_v31  ;;  %1302 = vmatpush.msrb.mxu0 %v3635_v0  ;;  %v3799_v56 = vand.u32 4294901760, %v76_v15 }
  0x9e   :  { %1384 = vmatpush.msrb.mxu2 %v1232_v55  ;;  %1430 = vmatpush.msrb.mxu3 %v3584_v60 }
  0x9f   :  { %1271 = vmatpush.msra.mxu1 %v1270_v29  ;;  %1167 = vmatmul.f32.vlgmr.msra.gmra.mxu3 %v3103_v31  ;;  %v3823_v57 = vsub.f32 %v76_v15, %v3799_v56  ;;  %v36_v29 = vld [vmem:[%s4851_s1 + $0x90] sm:$0xff] }
  0xa0   :  { %1305 = vmatpush.msrb.mxu0 %v3657_v48  ;;  %1388 = vmatpush.msrb.mxu2 %v1238_v11 }
  0xa1   :  { %1432 = vmatpush.msrb.mxu3 %v3600_v18  ;;  %1277 = vmatpush.msra.mxu1 %v1276_v52  ;;  %v4885_v11 = vand.u32 4294901760, %v3823_v57 }
  0xa2   :  { %1308 = vmatpush.msrb.mxu0 %v3668_v54  ;;  %1392 = vmatpush.msrb.mxu2 %v1244_v49  ;;  %v56_v54 = vld [vmem:[%s4851_s1 + $0x130] sm:$0xff]  ;;  %v3856_v49 = vsub.f32 %v68_v61, %v3827_v21 }
  0xa3   :  { %1340 = vmatpush.msrb.mxu1 %v3584_v60  ;;  %1434 = vmatpush.msrb.mxu3 %v3610_v33  ;;  %v72_v60 = vld [vmem:[%s4851_s1 + $0x1b0] sm:$0xff]  ;;  %v1514_v58 = vsub.f32 %v3823_v57, %v4885_v11 }
  0xa4   :  { %1279 = vmatmul.f32.vlgmr.msra.gmra.mxu1 %v3166_v24  ;;  %1213 = vmatmul.f32.gmra.mxu0 %v3297_v37  ;;  %v4883_v20 = vand.u32 4294901760, %v3856_v49 }
  0xa5   :  { %1311 = vmatpush.msrb.mxu0 %v3693_v40  ;;  %1342 = vmatpush.msrb.mxu1 %v3600_v18  ;;  %v3810_v18 = vsub.f32 %v80_v2, %v3792_v44  ;;  %v3940_v2 = vsub.f32 %v48_v50, %v3911_v38  ;;  %v116_v50 = vld [vmem:[%s4851_s1 + $0x310] sm:$0xf] }
  0xa6   :  { %1396 = vmatpush.msrb.mxu2 %v1250_v30  ;;  %1436 = vmatpush.msrb.mxu3 %v3628_v6  ;;  %v3872_v30 = vand.u32 4294901760, %v56_v54 }
  0xa7   :  { %1314 = vmatpush.msrb.mxu0 %v3704_v63  ;;  %1344 = vmatpush.msrb.mxu1 %v3610_v33  ;;  %v3818_v33 = vand.u32 4294901760, %v72_v60  ;;  %v4887_v0 = vand.u32 4294901760, %v3810_v18 }
  0xa8   :  { %1400 = vmatpush.msrb.mxu2 %v1256_v12  ;;  %1438 = vmatpush.msrb.mxu3 %v3639_v36  ;;  %v3904_v47 = vsub.f32 %v56_v54, %v3872_v30 }
  0xa9   :  { %1130 = vmatmul.f32.gmra.mxu2 %v3174_v23  ;;  %1317 = vmatpush.msrb.mxu0 %v3722_v28  ;;  %v3839_v55 = vsub.f32 %v72_v60, %v3818_v33  ;;  %v32_v60 = vld [vmem:[%s4851_s1 + $0x70] sm:$0xff] }
  0xaa   :  { %1346 = vmatpush.msrb.mxu1 %v3628_v6  ;;  %1404 = vmatpush.msrb.mxu2 %v1262_v8  ;;  %v64_v6 = vld [vmem:[%s4851_s1 + $0x170] sm:$0xff]  ;;  %v4882_v19 = vand.u32 4294901760, %v3904_v47 }
  0xab   :  { %1440 = vmatpush.msrb.mxu3 %v3661_v3  ;;  %1320 = vmatpush.msrb.mxu0 %v3730_v13  ;;  %v3846_v48 = vand.u32 4294901760, %v64_v6  ;;  %v4884_v9 = vand.u32 4294901760, %v3839_v55  ;;  %v1515_v13 = vand.u32 4294901760, %v1514_v58  ;;  %v3960_v58 = vand.u32 4294901760, %v36_v29 }
  0xac   :  { %1171 = vmatmul.f32.gmra.mxu3 %v3174_v23  ;;  %1348 = vmatpush.msrb.mxu1 %v3639_v36  ;;  %v60_v36 = vld [vmem:[%s4851_s1 + $0x150] sm:$0xff]  ;;  %v3868_v40 = vpop.f32.mrf.mxu2 }
  0xad   :  { %1408 = vmatpush.msrb.mxu2 %v1268_v7  ;;  %1442 = vmatpush.msrb.mxu3 %v3675_v46  ;;  %v3863_v16 = vand.u32 4294901760, %v60_v36  ;;  %v3881_v63 = vsub.f32 %v64_v6, %v3846_v48  ;;  %v1520_v8 = vsub.f32 %v3839_v55, %v4884_v9  ;;  %v1526_v7 = vsub.f32 %v3856_v49, %v4883_v20 }
  0xae   :  { %1283 = vmatmul.f32.gmra.mxu1 %v3227_v34  ;;  %1457 = vmatpush.msra.mxu0 %v3792_v44  ;;  %4980 = vst [vmem:[#allocation17_spill] sm:$0xff] %v3960_v58  ;;  %v145_v20 = vsel %vm137_vm0, %v116_v50, 0  ;;  %v3993_v9 = vsub.f32 %v36_v29, %v3960_v58  ;;  %v112_v29 = vld [vmem:[%s4851_s1 + $0x2f0] sm:$0xff] }
  0xaf   :  { %1323 = vmatmul.f32.vlgmr.msrb.gmra.mxu0 %v3195_v25  ;;  %1350 = vmatpush.msrb.mxu1 %v3661_v3  ;;  %v1508_v3 = vsub.f32 %v3810_v18, %v4887_v0  ;;  %v3894_v59 = vsub.f32 %v60_v36, %v3863_v16  ;;  %v4881_v17 = vand.u32 4294901760, %v3881_v63  ;;  %v1521_v35 = vand.u32 4294901760, %v1520_v8 }
  0xb0   :  { %1412 = vmatpush.msrb.mxu2 %v1274_v41  ;;  %1444 = vmatpush.msrb.mxu3 %v3697_v32  ;;  %v3896_v28 = vpop.f32.mrf.mxu3  ;;  %v1527_v6 = vand.u32 4294901760, %v1526_v7  ;;  %v3969_v8 = vand.u32 4294901760, %v32_v60 }
  0xb1   :  { %1459 = vmatpush.msra.mxu0 %v3799_v56  ;;  %1352 = vmatpush.msrb.mxu1 %v3675_v46  ;;  %v3885_v46 = vand.u32 4294901760, %v52_v22  ;;  %v1509_v12 = vand.u32 4294901760, %v1508_v3  ;;  %v188_v41 = vpop.f32.mrf.mxu0  ;;  %v4880_v43 = vand.u32 4294901760, %v3894_v59  ;;  %v1532_v52 = vsub.f32 %v3881_v63, %v4881_v17 }
  0xb2   :  { %1612 = vmatpush.msra.mxu2 %v3810_v18  ;;  %1446 = vmatpush.msrb.mxu3 %v3710_v27  ;;  %4981 = vst [vmem:[#allocation18_spill] sm:$0xff] %v3969_v8  ;;  %v4004_v50 = vsub.f32 %v32_v60, %v3969_v8  ;;  %v4017_v60 = vand.u32 4294901760, %v145_v20 }
  0xb3   :  { %1414 = vmatmul.f32.vlgmr.msrb.gmra.mxu2 %v3166_v24  ;;  %1461 = vmatpush.msra.mxu0 %v3818_v33  ;;  %4976 = vst [vmem:[#allocation13_spill] sm:$0xff] %v3885_v46  ;;  %v3920_v53 = vsub.f32 %v52_v22, %v3885_v46  ;;  %v1538_v3 = vsub.f32 %v3894_v59, %v4880_v43 }
  0xb4   :  { %1615 = vmatpush.msra.mxu2 %v3823_v57  ;;  %1670 = vmatpush.msra.mxu3 %v3792_v44  ;;  %v4048_v37 = vsub.f32 %v145_v20, %v4017_v60  ;;  %v4988_v20 = vand.u32 4294901760, %v3993_v9 }
  0xb5   :  { %1354 = vmatpush.msrb.mxu1 %v3697_v32  ;;  %1448 = vmatmul.f32.vlgmr.msrb.gmra.mxu3 %v3166_v24  ;;  %v44_v32 = vld [vmem:[%s4851_s1 + $0xd0] sm:$0xff]  ;;  %v4886_v36 = vand.u32 4294901760, %v3920_v53 }
  0xb6   :  { %1463 = vmatpush.msra.mxu0 %v3827_v21  ;;  %1618 = vmatpush.msra.mxu2 %v3839_v55  ;;  %v3926_v1 = vand.u32 4294901760, %v44_v32 }
  0xb7   :  { %1672 = vmatpush.msra.mxu3 %v3799_v56  ;;  %1356 = vmatpush.msrb.mxu1 %v3710_v27  ;;  %v40_v27 = vld [vmem:[%s4851_s1 + $0xb0] sm:$0xff]  ;;  %v3947_v61 = vpop.f32.mrf.mxu2 }
  0xb8   :  { %1360 = vmatmul.f32.vlgmr.msrb.gmra.mxu1 %v3216_v39  ;;  %1465 = vmatpush.msra.mxu0 %v3846_v48  ;;  %4978 = vst [vmem:[#allocation15_spill] sm:$0xff] %v3926_v1  ;;  %v3942_v15 = vand.u32 4294901760, %v40_v27  ;;  %v3958_v22 = vsub.f32 %v44_v32, %v3926_v1  ;;  %v28_v32 = vld [vmem:[%s4851_s1 + $0x50] sm:$0xff] }
  0xb9   :  { %1510 = vmatpush.msra.mxu1 %v1509_v12  ;;  %1621 = vmatpush.msra.mxu2 %v3856_v49  ;;  %v1544_v12 = vsub.f32 %v3904_v47, %v4882_v19  ;;  %v1550_v19 = vsub.f32 %v3920_v53, %v4886_v36  ;;  %v3995_v11 = vand.u32 4294901760, %v28_v32  ;;  %v24_v36 = vld [vmem:[%s4851_s1 + $0x30] sm:$0xff] }
  0xba   :  { %1674 = vmatpush.msra.mxu3 %v3818_v33  ;;  %1328 = vmatmul.f32.gmra.mxu0 %v3243_v10  ;;  %4979 = vst [vmem:[#allocation16_spill] sm:$0xff] %v3942_v15  ;;  %v3977_v7 = vsub.f32 %v40_v27, %v3942_v15  ;;  %v3982_v17 = vpop.f32.mrf.mxu3  ;;  %v1539_v27 = vand.u32 4294901760, %v1538_v3  ;;  %v196_v3 = vpop.f32.mrf.mxu0 }
  0xbb   :  { %1467 = vmatpush.msra.mxu0 %v3863_v16  ;;  %1516 = vmatpush.msra.mxu1 %v1515_v13  ;;  %v297_v54 = vpop.f32.mrf.mxu1  ;;  %v1533_v13 = vand.u32 4294901760, %v1532_v52  ;;  %v4028_v10 = vsub.f32 %v28_v32, %v3995_v11 }
  0xbc   :  { %1624 = vmatpush.msra.mxu2 %v3881_v63  ;;  %1676 = vmatpush.msra.mxu3 %v3827_v21  ;;  %v4986_v25 = vand.u32 4294901760, %v3977_v7 }
  0xbd   :  { %1418 = vmatmul.f32.gmra.mxu2 %v3227_v34  ;;  %1469 = vmatpush.msra.mxu0 %v3872_v30  ;;  %4985 = vst [vmem:[#allocation21_spill] sm:$0xff] %v4028_v10 }
  0xbe   :  { %1522 = vmatpush.msra.mxu1 %v1521_v35  ;;  %1627 = vmatpush.msra.mxu2 %v3894_v59  ;;  %v4892_v35 = vand.u32 4294901760, %v3940_v2 }
  0xbf   :  { %1678 = vmatpush.msra.mxu3 %v3846_v48  ;;  %1471 = vmatpush.msra.mxu0 %v3885_v46  ;;  %v3980_v43 = vpop.permute.xlu0 %122 }
  0xc0   :  { %4982 = vst [vmem:[#allocation19_spill] sm:$0xff] %v3980_v43  ;;  %1452 = vmatmul.f32.gmra.mxu3 %v3227_v34  ;;  %1528 = vmatpush.msra.mxu1 %v1527_v6  ;;  %v189_v52 = vadd.f32 %v188_v41, %v3980_v43  ;;  %v1545_v41 = vand.u32 4294901760, %v1544_v12  ;;  %v1556_v0 = vsub.f32 %v3940_v2, %v4892_v35  ;;  %v20_v12 = vld [vmem:[%s4851_s1 + $0x10] sm:$0xff]  ;;  %v4984_v35 = vand.u32 4294901760, %v3958_v22 }
  0xc1   :  { %1630 = vmatpush.msra.mxu2 %v3904_v47  ;;  %1680 = vmatpush.msra.mxu3 %v3863_v16  ;;  %v1568_v34 = vsub.f32 %v3977_v7, %v4986_v25 }
  0xc2   :  { %1366 = vmatmul.f32.gmra.mxu1 %v3258_v14  ;;  %1473 = vmatpush.msra.mxu0 %v3911_v38  ;;  %v298_v43 = vadd.f32 %v297_v54, %v189_v52  ;;  %v4021_v14 = vand.u32 4294901760, %v24_v36  ;;  %v1562_v6 = vsub.f32 %v3958_v22, %v4984_v35  ;;  %v4031_v54 = vand.u32 4294901760, %v112_v29  ;;  %v4036_v52 = vpop.f32.mrf.mxu2 }
  0xc3   :  { %1534 = vmatpush.msra.mxu1 %v1533_v13  ;;  %1633 = vmatpush.msra.mxu2 %v3920_v53  ;;  %v1551_v13 = vand.u32 4294901760, %v1550_v19  ;;  %v108_v19 = vld [vmem:[%s4851_s1 + $0x2d0] sm:$0xff]  ;;  %v1557_v39 = vand.u32 4294901760, %v1556_v0 }
  0xc4   :  { %1682 = vmatpush.msra.mxu3 %v3872_v30  ;;  %1475 = vmatpush.msra.mxu0 %v3926_v1  ;;  %4983 = vst [vmem:[#allocation20_spill] sm:$0xff] %v4021_v14  ;;  %v356_v23 = vadd.f32 %v3868_v40, %v298_v43  ;;  %v4054_v35 = vsub.f32 %v24_v36, %v4021_v14  ;;  %v104_v0 = vld [vmem:[%s4851_s1 + $0x2b0] sm:$0xff]  ;;  %v1563_v25 = vand.u32 4294901760, %v1562_v6  ;;  %v4069_v36 = vpop.f32.mrf.mxu3 }
  0xc5   :  { %1540 = vmatpush.msra.mxu1 %v1539_v27  ;;  %1636 = vmatpush.msra.mxu2 %v3940_v2  ;;  %v4040_v27 = vand.u32 4294901760, %v20_v12  ;;  %v301_v32 = vpop.f32.mrf.mxu1  ;;  %v1574_v40 = vsub.f32 %v3993_v9, %v4988_v20  ;;  %v4067_v24 = vsub.f32 %v112_v29, %v4031_v54  ;;  %v100_v20 = vld [vmem:[%s4851_s1 + $0x290] sm:$0xff]  ;;  %v1569_v29 = vand.u32 4294901760, %v1568_v34 }
  0xc6   :  { %1684 = vmatpush.msra.mxu3 %v3885_v46  ;;  %1477 = vmatpush.msra.mxu0 %v3942_v15  ;;  %4987 = vst [vmem:[#allocation22_spill] sm:$0xff] %v4054_v35  ;;  %v400_v51 = vadd.f32 %v3896_v28, %v356_v23  ;;  %v96_v34 = vld [vmem:[%s4851_s1 + $0x270] sm:$0xff]  ;;  %v4991_v28 = vand.u32 4294901760, %v4028_v10  ;;  %v4104_v45 = vand.u32 4294901760, %v100_v20 }
  0xc7   :  { %1546 = vmatpush.msra.mxu1 %v1545_v41  ;;  %1639 = vmatpush.msra.mxu2 %v3958_v22  ;;  %v4056_v41 = vand.u32 4294901760, %v108_v19  ;;  %v4077_v6 = vsub.f32 %v20_v12, %v4040_v27  ;;  %v1575_v23 = vand.u32 4294901760, %v1574_v40 }
  0xc8   :  { %1686 = vmatpush.msra.mxu3 %v3911_v38  ;;  %1479 = vmatpush.msra.mxu0 %v3960_v58  ;;  %v4134_v46 = vsub.f32 %v100_v20, %v4104_v45 }
  0xc9   :  { %1552 = vmatpush.msra.mxu1 %v1551_v13  ;;  %1642 = vmatpush.msra.mxu2 %v3977_v7  ;;  %v4989_v13 = vand.u32 4294901760, %v4004_v50 }
  0xca   :  { %1688 = vmatpush.msra.mxu3 %v3926_v1  ;;  %1481 = vmatpush.msra.mxu0 %v3969_v8  ;;  %v4084_v1 = vand.u32 4294901760, %v104_v0 }
  0xcb   :  { %v1580_v38 = vsub.f32 %v4004_v50, %v4989_v13  ;;  %1558 = vmatpush.msra.mxu1 %v1557_v39  ;;  %1645 = vmatpush.msra.mxu2 %v3993_v9  ;;  %v4087_v31 = vpop.permute.xlu0 %127  ;;  %v4093_v13 = vsub.f32 %v108_v19, %v4056_v41  ;;  %v474_v39 = vpop.f32.mrf.mxu0 }
  0xcc   :  { %4990 = vst [vmem:[#allocation23_spill] sm:$0xff] %v4087_v31  ;;  %1690 = vmatpush.msra.mxu3 %v3942_v15  ;;  %1483 = vmatpush.msra.mxu0 %v3995_v11  ;;  %v197_v43 = vadd.f32 %v196_v3, %v4087_v31  ;;  %v1586_v15 = vsub.f32 %v4028_v10, %v4991_v28  ;;  %v4116_v31 = vand.u32 4294901760, %v96_v34 }
  0xcd   :  { %1564 = vmatpush.msra.mxu1 %v1563_v25  ;;  %1648 = vmatpush.msra.mxu2 %v4004_v50  ;;  %v1581_v19 = vand.u32 4294901760, %v1580_v38  ;;  %v4992_v25 = vand.u32 4294901760, %v4048_v37  ;;  %v4114_v28 = vsub.f32 %v104_v0, %v4084_v1  ;;  %v475_v12 = vadd.f32 %v474_v39, %v400_v51  ;;  %v92_v38 = vld [vmem:[%s4851_s1 + $0x250] sm:$0xff] }
  0xce   :  { %1692 = vmatpush.msra.mxu3 %v3960_v58  ;;  %1485 = vmatpush.msra.mxu0 %v4021_v14  ;;  %v302_v3 = vadd.f32 %v301_v32, %v197_v43  ;;  %v4121_v58 = vpop.f32.mrf.mxu2  ;;  %v4993_v32 = vand.u32 4294901760, %v4054_v35  ;;  %v1587_v51 = vand.u32 4294901760, %v1586_v15  ;;  %v4994_v39 = vand.u32 4294901760, %v4067_v24 }
  0xcf   :  { %1570 = vmatpush.msra.mxu1 %v1569_v29  ;;  %1651 = vmatpush.msra.mxu2 %v4028_v10  ;;  %v1880_v40 = vsub.f32 %v4048_v37, %v4992_v25  ;;  %v4145_v0 = vand.u32 4294901760, %v92_v38 }
  0xd0   :  { %1694 = vmatpush.msra.mxu3 %v3969_v8  ;;  %1487 = vmatpush.msra.mxu0 %v4040_v27  ;;  %v1592_v43 = vsub.f32 %v4054_v35, %v4993_v32  ;;  %v515_v29 = vpop.f32.mrf.mxu1  ;;  %v1886_v25 = vsub.f32 %v4067_v24, %v4994_v39  ;;  %v88_v8 = vld [vmem:[%s4851_s1 + $0x230] sm:$0xff]  ;;  %v4995_v32 = vand.u32 4294901760, %v3810_v18  ;;  %v361_v39 = vadd.f32 %v3947_v61, %v302_v3 }
  0xd1   :  { %1576 = vmatpush.msra.mxu1 %v1575_v23  ;;  %1654 = vmatpush.msra.mxu2 %v4054_v35  ;;  %v516_v10 = vadd.f32 %v515_v29, %v475_v12  ;;  %v4996_v23 = vand.u32 4294901760, %v4077_v6  ;;  %v1881_v20 = vand.u32 4294901760, %v1880_v40  ;;  %v4151_v12 = vsub.f32 %v96_v34, %v4116_v31  ;;  %v84_v18 = vld [vmem:[%s4851_s1 + $0x210] sm:$0xff]  ;;  %v4156_v29 = vpop.f32.mrf.mxu3 }
  0xd2   :  { %1696 = vmatpush.msra.mxu3 %v3995_v11  ;;  %1717 = vmatpush.msrb.mxu0 %v4995_v32  ;;  %v4997_v32 = vand.u32 4294901760, %v3823_v57  ;;  %v1593_v61 = vand.u32 4294901760, %v1592_v43  ;;  %v4164_v40 = vand.u32 4294901760, %v88_v8  ;;  %v1887_v34 = vand.u32 4294901760, %v1886_v25 }
  0xd3   :  { %v1598_v15 = vsub.f32 %v4077_v6, %v4996_v23  ;;  %1582 = vmatpush.msra.mxu1 %v1581_v19  ;;  %1657 = vmatpush.msra.mxu2 %v4077_v6  ;;  %v4998_v19 = vand.u32 4294901760, %v4093_v13  ;;  %v1903_v23 = vand.u32 4294901760, %v4134_v46  ;;  %v554_v35 = vadd.f32 %v4036_v52, %v516_v10  ;;  %v478_v25 = vpop.f32.mrf.mxu0 }
  0xd4   :  { %1698 = vmatpush.msra.mxu3 %v4021_v14  ;;  %1721 = vmatpush.msrb.mxu0 %v4997_v32  ;;  %v4999_v57 = vand.u32 4294901760, %v3839_v55  ;;  %v4173_v32 = vsub.f32 %v92_v38, %v4145_v0  ;;  %v406_v14 = vadd.f32 %v3982_v17, %v361_v39  ;;  %v1909_v52 = vand.u32 4294901760, %v4151_v12 }
  0xd5   :  { %v1892_v3 = vsub.f32 %v4093_v13, %v4998_v19  ;;  %1836 = vmatpush.msrb.mxu2 %v4017_v60  ;;  %1588 = vmatpush.msra.mxu1 %v1587_v51  ;;  %v1599_v43 = vand.u32 4294901760, %v1598_v15  ;;  %v4175_v19 = vand.u32 4294901760, %v84_v18  ;;  %v5000_v51 = vand.u32 4294901760, %v4114_v28 }
  0xd6   :  { %1700 = vmatpush.msra.mxu3 %v4040_v27  ;;  %1725 = vmatpush.msrb.mxu0 %v4999_v57  ;;  %v5001_v55 = vand.u32 4294901760, %v3856_v49  ;;  %v4186_v15 = vsub.f32 %v88_v8, %v4164_v40  ;;  %v1904_v17 = vsub.f32 %v4134_v46, %v1903_v23  ;;  %v628_v39 = vadd.f32 %v4069_v36, %v554_v35 }
  0xd7   :  { %1838 = vmatpush.msrb.mxu2 %v4031_v54  ;;  %v1898_v10 = vsub.f32 %v4114_v28, %v5000_v51  ;;  %1594 = vmatpush.msra.mxu1 %v1593_v61  ;;  %v1893_v38 = vand.u32 4294901760, %v1892_v3  ;;  %v1915_v49 = vand.u32 4294901760, %v4173_v32  ;;  %v4196_v61 = vsub.f32 %v84_v18, %v4175_v19 }
  0xd8   :  { %1882 = vmatpush.msrb.mxu3 %v1881_v20  ;;  %1729 = vmatpush.msrb.mxu0 %v5001_v55  ;;  %v671_v20 = vpop.f32.mrf.mxu2  ;;  %v479_v8 = vadd.f32 %v478_v25, %v406_v14  ;;  %v5002_v3 = vand.u32 4294901760, %v3881_v63  ;;  %v1910_v35 = vsub.f32 %v4151_v12, %v1909_v52  ;;  %v1921_v57 = vand.u32 4294901760, %v4186_v15 }
  0xd9   :  { %1840 = vmatpush.msrb.mxu2 %v4056_v41  ;;  %1600 = vmatpush.msra.mxu1 %v1599_v43  ;;  %v5003_v14 = vand.u32 4294901760, %v3894_v59  ;;  %v1905_v63 = vand.u32 4294901760, %v1904_v17  ;;  %v672_v18 = vadd.f32 %v671_v20, %v628_v39  ;;  %v1916_v51 = vsub.f32 %v4173_v32, %v1915_v49 }
  0xda   :  { %1888 = vmatpush.msrb.mxu3 %v1887_v34  ;;  %1660 = vmatmul.f32.vlgmr.msra.gmra.mxu2 %v3135_v42  ;;  %v1899_v34 = vand.u32 4294901760, %v1898_v10  ;;  %v1927_v10 = vand.u32 4294901760, %v4196_v61  ;;  %v5004_v55 = vand.u32 4294901760, %v3904_v47  ;;  %v1911_v59 = vand.u32 4294901760, %v1910_v35 }
  0xdb   :  { %1733 = vmatpush.msrb.mxu0 %v5002_v3  ;;  %1788 = vmatpush.msrb.mxu1 %v3792_v44  ;;  %v519_v36 = vpop.f32.mrf.mxu1  ;;  %v708_v44 = vpop.f32.mrf.mxu3  ;;  %v1917_v47 = vand.u32 4294901760, %v1916_v51  ;;  %v5007_v3 = vand.u32 4294901760, %v3958_v22  ;;  %v5013_v51 = vld [vmem:[#allocation10_spill] sm:$0xff] }
  0xdc   :  { %1842 = vmatpush.msrb.mxu2 %v4084_v1  ;;  %1894 = vmatpush.msrb.mxu3 %v1893_v38  ;;  %v520_v43 = vadd.f32 %v519_v36, %v479_v8  ;;  %v5005_v38 = vand.u32 4294901760, %v3920_v53  ;;  %v709_v17 = vadd.f32 %v708_v44, %v672_v18  ;;  %v5006_v53 = vand.u32 4294901760, %v3940_v2  ;;  %v5012_v18 = vld [vmem:[#allocation2_spill] sm:$0xff] }
  0xdd   :  { %1704 = vmatmul.f32.vlgmr.msra.gmra.mxu3 %v3163_v26  ;;  %1737 = vmatpush.msrb.mxu0 %v5003_v14  ;;  %v81_v14 = vld [vmem:[%s4851_s1 + $0x1f8] sm:$0xff] }
  0xde   :  { %1790 = vmatpush.msrb.mxu1 %v3799_v56  ;;  %1844 = vmatpush.msrb.mxu2 %v4104_v45  ;;  %v562_v25 = vadd.f32 %v4121_v58, %v520_v43  ;;  %v1922_v56 = vsub.f32 %v4186_v15, %v1921_v57  ;;  %v4259_v44 = vand.u32 4294901760, %v81_v14 }
  0xdf   :  { %1900 = vmatpush.msrb.mxu3 %v1899_v34  ;;  %1741 = vmatpush.msrb.mxu0 %v5004_v55  ;;  %v762_v39 = vpop.f32.mrf.mxu0  ;;  %v77_v55 = vld [vmem:[%s4851_s1 + $0x1d8] sm:$0xff] }
  0xe0   :  { %1792 = vmatpush.msrb.mxu1 %v3818_v33  ;;  %1846 = vmatpush.msrb.mxu2 %v4116_v31  ;;  %v1928_v33 = vsub.f32 %v4196_v61, %v1927_v10  ;;  %v632_v58 = vadd.f32 %v4156_v29, %v562_v25  ;;  %v1923_v8 = vand.u32 4294901760, %v1922_v56  ;;  %v5015_v56 = vld [vmem:[#allocation14_spill] sm:$0xff] }
  0xe1   :  { %1906 = vmatpush.msrb.mxu3 %v1905_v63  ;;  %1745 = vmatpush.msrb.mxu0 %v5005_v38  ;;  %v676_v20 = vpop.f32.mrf.mxu2  ;;  %v5010_v63 = vld [vmem:[#allocation13_spill] sm:$0xff]  ;;  %v5016_v38 = vld [vmem:[#allocation3_spill] sm:$0xff] }
  0xe2   :  { %1794 = vmatpush.msrb.mxu1 %v3827_v21  ;;  %1848 = vmatpush.msrb.mxu2 %v4145_v0  ;;  %v763_v21 = vadd.f32 %v762_v39, %v709_v17  ;;  %v1929_v29 = vand.u32 4294901760, %v1928_v33  ;;  %v677_v34 = vadd.f32 %v676_v20, %v632_v58  ;;  %v73_v17 = vld [vmem:[%s4851_s1 + $0x1b8] sm:$0xff]  ;;  %v4279_v33 = vand.u32 4294901760, %v77_v55  ;;  %v5019_v20 = vld [vmem:[#allocation15_spill] sm:$0xff] }
  0xe3   :  { %1912 = vmatpush.msrb.mxu3 %v1911_v59  ;;  %1493 = vmatmul.f32.vlgmr.msra.gmra.mxu0 %v3205_v4 }
  0xe4   :  { %1665 = vmatmul.f32.gmra.mxu2 %v3199_v62  ;;  %1749 = vmatpush.msrb.mxu0 %v5006_v53  ;;  %v714_v36 = vpop.f32.mrf.mxu3  ;;  %v69_v53 = vld [vmem:[%s4851_s1 + $0x198] sm:$0xff] }
  0xe5   :  { %1796 = vmatpush.msrb.mxu1 %v3846_v48  ;;  %1850 = vmatpush.msrb.mxu2 %v4164_v40  ;;  %v5008_v48 = vand.u32 4294901760, %v3977_v7  ;;  %v715_v22 = vadd.f32 %v714_v36, %v677_v34  ;;  %v5009_v7 = vand.u32 4294901760, %v3993_v9  ;;  %v5014_v9 = vand.u32 4294901760, %v4004_v50  ;;  %v5017_v50 = vld [vmem:[#allocation21_spill] sm:$0xff]  ;;  %v5022_v34 = vld [vmem:[#allocation16_spill] sm:$0xff] }
  0xe6   :  { %1918 = vmatpush.msrb.mxu3 %v1917_v47  ;;  %1753 = vmatpush.msrb.mxu0 %v5007_v3  ;;  %v796_v35 = vpop.f32.mrf.mxu1  ;;  %v4277_v47 = vsub.f32 %v81_v14, %v4259_v44  ;;  %v5018_v58 = vand.u32 4294901760, %v5017_v50  ;;  %v5020_v3 = vld [vmem:[#allocation22_spill] sm:$0xff]  ;;  %v5025_v14 = vld [vmem:[#allocation4_spill] sm:$0xff] }
  0xe7   :  { %1710 = vmatmul.f32.gmra.mxu3 %v3220_v5  ;;  %1798 = vmatpush.msrb.mxu1 %v3863_v16  ;;  %v797_v2 = vadd.f32 %v796_v35, %v763_v21  ;;  %v4289_v21 = vand.u32 4294901760, %v73_v17  ;;  %v65_v35 = vld [vmem:[%s4851_s1 + $0x178] sm:$0xff] }
  0xe8   :  { %1852 = vmatpush.msrb.mxu2 %v4175_v19  ;;  %1924 = vmatpush.msrb.mxu3 %v1923_v8  ;;  %v766_v16 = vpop.f32.mrf.mxu0  ;;  %v4932_v36 = vand.u32 4294901760, %v4277_v47 }
  0xe9   :  { %1757 = vmatpush.msrb.mxu0 %v5008_v48  ;;  %v2762_v43 = vmax.f32 %v797_v2, 0.0  ;;  %1800 = vmatpush.msrb.mxu1 %v3872_v30  ;;  %v5011_v30 = vld [vmem:[#allocation9_spill] sm:$0xff]  ;;  %v767_v25 = vadd.f32 %v766_v16, %v715_v22  ;;  %v4304_v2 = vsub.f32 %v77_v55, %v4279_v33  ;;  %v4306_v48 = vand.u32 4294901760, %v69_v53 }
  0xea   :  { %1949 = vmatpush.msra.mxu2 %v4048_v37  ;;  %1930 = vmatpush.msrb.mxu3 %v1929_v29  ;;  %v5021_v29 = vand.u32 4294901760, %v5020_v3  ;;  %v5024_v22 = vld [vmem:[#allocation17_spill] sm:$0xff]  ;;  %v4314_v16 = vsub.f32 %v73_v17, %v4289_v21  ;;  %v2161_v55 = vsub.f32 %v4277_v47, %v4932_v36  ;;  %v5029_v17 = vld [vmem:[#allocation7_spill] sm:$0xff] }
  0xeb   :  { %2770 = vst [vmem:[%s4854_s3] sm:$0xff] %v2762_v43  ;;  %1761 = vmatpush.msrb.mxu0 %v5009_v7  ;;  %1802 = vmatpush.msrb.mxu1 %v5010_v63  ;;  %v5023_v43 = vand.u32 4294901760, %v4077_v6  ;;  %v4316_v7 = vand.u32 4294901760, %v65_v35  ;;  %v61_v63 = vld [vmem:[%s4851_s1 + $0x158] sm:$0xff]  ;;  %v5027_v6 = vand.u32 4294901760, %v4048_v37 }
  0xec   :  { %1952 = vmatpush.msra.mxu2 %v4067_v24  ;;  %1993 = vmatpush.msra.mxu3 %v4017_v60  ;;  %v57_v37 = vld [vmem:[%s4851_s1 + $0x138] sm:$0xff]  ;;  %v4929_v50 = vand.u32 4294901760, %v4314_v16 }
  0xed   :  { %1501 = vmatmul.f32.gmra.mxu0 %v5011_v30  ;;  %1602 = vmatmul.f32.vlgmr.msra.gmra.mxu1 %v5012_v18 }
  0xee   :  { %1858 = vmatmul.f32.vlgmr.msrb.gmra.mxu2 %v5013_v51  ;;  %1995 = vmatpush.msra.mxu3 %v4031_v54 }
  0xef   :  { %1955 = vmatpush.msra.mxu2 %v4093_v13  ;;  %1765 = vmatpush.msrb.mxu0 %v5014_v9  ;;  %v800_v59 = vpop.f32.mrf.mxu1  ;;  %v4931_v9 = vand.u32 4294901760, %v4304_v2 }
  0xf0   :  { %1804 = vmatpush.msrb.mxu1 %v5015_v56  ;;  %1932 = vmatmul.f32.vlgmr.msrb.gmra.mxu3 %v5016_v38  ;;  %v801_v39 = vadd.f32 %v800_v59, %v767_v25  ;;  %v5026_v25 = vld [vmem:[#allocation12_spill] sm:$0xff]  ;;  %v4331_v59 = vsub.f32 %v69_v53, %v4306_v48  ;;  %v5028_v56 = vld [vmem:[#allocation18_spill] sm:$0xff]  ;;  %v53_v53 = vld [vmem:[%s4851_s1 + $0x118] sm:$0xff] }
  0xf1   :  { %1958 = vmatpush.msra.mxu2 %v4114_v28  ;;  %1997 = vmatpush.msra.mxu3 %v4056_v41  ;;  %v2167_v3 = vsub.f32 %v4304_v2, %v4931_v9 }
  0xf2   :  { %1769 = vmatpush.msrb.mxu0 %v5018_v58  ;;  %1806 = vmatpush.msrb.mxu1 %v5019_v20  ;;  %v2766_v8 = vmax.f32 %v801_v39, 0.0  ;;  %v4335_v39 = vand.u32 4294901760, %v61_v63  ;;  %v4344_v58 = vsub.f32 %v65_v35, %v4316_v7  ;;  %v5030_v20 = vand.u32 4294901760, %v4067_v24 }
  0xf3   :  { %1961 = vmatpush.msra.mxu2 %v4134_v46  ;;  %1999 = vmatpush.msra.mxu3 %v4084_v1  ;;  %v5031_v24 = vand.u32 4294901760, %v4093_v13 }
  0xf4   :  { %1773 = vmatpush.msrb.mxu0 %v5021_v29  ;;  %1808 = vmatpush.msrb.mxu1 %v5022_v34  ;;  %2774 = vst [vmem:[%s4854_s3 + $0x20] sm:$0xff] %v2766_v8  ;;  %v2162_v8 = vand.u32 4294901760, %v2161_v55  ;;  %v4926_v29 = vand.u32 4294901760, %v4331_v59  ;;  %v4358_v34 = vand.u32 4294901760, %v57_v37  ;;  %v4364_v35 = vsub.f32 %v61_v63, %v4335_v39 }
  0xf5   :  { %1964 = vmatpush.msra.mxu2 %v4151_v12  ;;  %2001 = vmatpush.msra.mxu3 %v4104_v45  ;;  %v4924_v13 = vand.u32 4294901760, %v4344_v58  ;;  %v5033_v55 = vand.u32 4294901760, %v4114_v28  ;;  %v2168_v63 = vand.u32 4294901760, %v2167_v3  ;;  %v45_v28 = vld [vmem:[%s4851_s1 + $0xd8] sm:$0xff] }
  0xf6   :  { %1777 = vmatpush.msrb.mxu0 %v5023_v43  ;;  %1810 = vmatpush.msrb.mxu1 %v5024_v22  ;;  %v49_v43 = vld [vmem:[%s4851_s1 + $0xf8] sm:$0xff]  ;;  %v2173_v22 = vsub.f32 %v4314_v16, %v4929_v50  ;;  %v4409_v46 = vand.u32 4294901760, %v45_v28 }
  0xf7   :  { %1606 = vmatmul.f32.gmra.mxu1 %v5025_v14  ;;  %1779 = vmatmul.f32.vlgmr.msrb.gmra.mxu0 %v5012_v18 }
  0xf8   :  { %1866 = vmatmul.f32.gmra.mxu2 %v5026_v25  ;;  %2003 = vmatpush.msra.mxu3 %v4116_v31  ;;  %v2174_v3 = vand.u32 4294901760, %v2173_v22  ;;  %v37_v22 = vld [vmem:[%s4851_s1 + $0x98] sm:$0xff] }
  0xf9   :  { %1967 = vmatpush.msra.mxu2 %v4173_v32  ;;  %2033 = vmatpush.msra.mxu0 %v5027_v6  ;;  %v4375_v6 = vand.u32 4294901760, %v53_v53 }
  0xfa   :  { %1812 = vmatpush.msrb.mxu1 %v5028_v56  ;;  %1936 = vmatmul.f32.gmra.mxu3 %v5029_v17  ;;  %v2179_v56 = vsub.f32 %v4331_v59, %v4926_v29 }
  0xfb   :  { %1970 = vmatpush.msra.mxu2 %v4186_v15  ;;  %2005 = vmatpush.msra.mxu3 %v4145_v0 }
  0xfc   :  { %2037 = vmatpush.msra.mxu0 %v5030_v20  ;;  %1814 = vmatpush.msrb.mxu1 %v3995_v11  ;;  %v5032_v11 = vld [vmem:[#allocation20_spill] sm:$0xff]  ;;  %v4385_v20 = vsub.f32 %v57_v37, %v4358_v34  ;;  %v2185_v37 = vsub.f32 %v4344_v58, %v4924_v13  ;;  %v5035_v13 = vld [vmem:[#allocation6_spill] sm:$0xff] }
  0xfd   :  { %1973 = vmatpush.msra.mxu2 %v4196_v61  ;;  %2007 = vmatpush.msra.mxu3 %v4164_v40 }
  0xfe   :  { %2041 = vmatpush.msra.mxu0 %v5031_v24  ;;  %1816 = vmatpush.msrb.mxu1 %v5032_v11  ;;  %v4387_v24 = vand.u32 4294901760, %v49_v43  ;;  %v4402_v11 = vsub.f32 %v53_v53, %v4375_v6 }
  0xff   :  { %2110 = vmatpush.msrb.mxu2 %v4259_v44  ;;  %2009 = vmatpush.msra.mxu3 %v4175_v19 }
 0x100   :  { %2045 = vmatpush.msra.mxu0 %v5033_v55  ;;  %1818 = vmatpush.msrb.mxu1 %v4040_v27  ;;  %v5034_v27 = vld [vmem:[#allocation5_spill] sm:$0xff]  ;;  %v4415_v53 = vsub.f32 %v49_v43, %v4387_v24  ;;  %v4927_v43 = vand.u32 4294901760, %v4402_v11 }
 0x101   :  { %2112 = vmatpush.msrb.mxu2 %v4279_v33  ;;  %2163 = vmatpush.msrb.mxu3 %v2162_v8  ;;  %v4925_v8 = vand.u32 4294901760, %v4364_v35  ;;  %v41_v55 = vld [vmem:[%s4851_s1 + $0xb8] sm:$0xff] }
 0x102   :  { %1820 = vmatmul.f32.vlgmr.msrb.gmra.mxu1 %v5012_v18  ;;  %1976 = vmatmul.f32.vlgmr.msra.gmra.mxu2 %v5034_v27  ;;  %v4425_v12 = vand.u32 4294901760, %v41_v55  ;;  %v2203_v15 = vsub.f32 %v4402_v11, %v4927_v43 }
 0x103   :  { %2049 = vmatpush.msra.mxu0 %v1903_v23  ;;  %2083 = vmatpush.msra.mxu1 %v4017_v60  ;;  %v2180_v60 = vand.u32 4294901760, %v2179_v56  ;;  %v4928_v23 = vand.u32 4294901760, %v4385_v20  ;;  %v33_v56 = vld [vmem:[%s4851_s1 + $0x78] sm:$0xff]  ;;  %v4445_v29 = vpop.f32.mrf.mxu0 }
 0x104   :  { %1783 = vmatmul.f32.gmra.mxu0 %v5025_v14  ;;  %2114 = vmatpush.msrb.mxu2 %v4289_v21  ;;  %v4451_v32 = vsub.f32 %v41_v55, %v4425_v12 }
 0x105   :  { %2169 = vmatpush.msrb.mxu3 %v2168_v63  ;;  %2053 = vmatpush.msra.mxu0 %v1909_v52  ;;  %v2191_v63 = vsub.f32 %v4364_v35, %v4925_v8  ;;  %v2186_v52 = vand.u32 4294901760, %v2185_v37  ;;  %v4438_v8 = vand.u32 4294901760, %v37_v22  ;;  %v4930_v37 = vand.u32 4294901760, %v4415_v53 }
 0x106   :  { %2013 = vmatmul.f32.vlgmr.msra.gmra.mxu3 %v5035_v13  ;;  %2085 = vmatpush.msra.mxu1 %v4031_v54  ;;  %v4436_v54 = vsub.f32 %v45_v28, %v4409_v46  ;;  %v29_v28 = vld [vmem:[%s4851_s1 + $0x58] sm:$0xff] }
 0x107   :  { %2116 = vmatpush.msrb.mxu2 %v4306_v48  ;;  %2175 = vmatpush.msrb.mxu3 %v2174_v3  ;;  %v2197_v3 = vsub.f32 %v4385_v20, %v4928_v23  ;;  %v4466_v55 = vsub.f32 %v37_v22, %v4438_v8  ;;  %v4477_v43 = vand.u32 4294901760, %v29_v28 }
 0x108   :  { %2057 = vmatpush.msra.mxu0 %v1915_v49  ;;  %2087 = vmatpush.msra.mxu1 %v4056_v41  ;;  %v2192_v41 = vand.u32 4294901760, %v2191_v63  ;;  %v4453_v49 = vand.u32 4294901760, %v33_v56 }
 0x109   :  { %2118 = vmatpush.msrb.mxu2 %v4316_v7  ;;  %2181 = vmatpush.msrb.mxu3 %v2180_v60  ;;  %v25_v60 = vld [vmem:[%s4851_s1 + $0x38] sm:$0xff]  ;;  %v2198_v63 = vand.u32 4294901760, %v2197_v3  ;;  %v2204_v3 = vand.u32 4294901760, %v2203_v15  ;;  %v4501_v36 = vsub.f32 %v29_v28, %v4477_v43 }
 0x10a   :  { %2061 = vmatpush.msra.mxu0 %v1921_v57  ;;  %2089 = vmatpush.msra.mxu1 %v4084_v1  ;;  %v5036_v1 = vld [vmem:[#allocation8_spill] sm:$0xff]  ;;  %v4933_v57 = vand.u32 4294901760, %v4436_v54  ;;  %v4484_v61 = vsub.f32 %v33_v56, %v4453_v49 }
 0x10b   :  { %2120 = vmatpush.msrb.mxu2 %v4335_v39  ;;  %2187 = vmatpush.msrb.mxu3 %v2186_v52  ;;  %v2209_v52 = vsub.f32 %v4415_v53, %v4930_v37  ;;  %v4479_v23 = vpop.f32.mrf.mxu1  ;;  %v841_v22 = vpop.f32.mrf.mxu2  ;;  %v4491_v37 = vand.u32 4294901760, %v25_v60 }
 0x10c   :  { %1824 = vmatmul.f32.gmra.mxu1 %v5025_v14  ;;  %1981 = vmatmul.f32.gmra.mxu2 %v5036_v1  ;;  %v2215_v56 = vsub.f32 %v4436_v54, %v4933_v57 }
 0x10d   :  { %2065 = vmatpush.msra.mxu0 %v1927_v10  ;;  %2091 = vmatpush.msra.mxu1 %v4104_v45  ;;  %v21_v45 = vld [vmem:[%s4851_s1 + $0x18] sm:$0xff]  ;;  %v5037_v10 = vld [vmem:[#allocation11_spill] sm:$0xff]  ;;  %v2210_v9 = vand.u32 4294901760, %v2209_v52  ;;  %v4515_v28 = vpop.f32.mrf.mxu0 }
 0x10e   :  { %2122 = vmatpush.msrb.mxu2 %v4358_v34  ;;  %2193 = vmatpush.msrb.mxu3 %v2192_v41  ;;  %v4503_v15 = vand.u32 4294901760, %v21_v45  ;;  %v950_v50 = vpop.f32.mrf.mxu3  ;;  %v4934_v41 = vand.u32 4294901760, %v4484_v61  ;;  %v2216_v52 = vand.u32 4294901760, %v2215_v56 }
 0x10f   :  { %2265 = vmatpush.msrb.mxu0 %v4277_v47  ;;  %2019 = vmatmul.f32.gmra.mxu3 %v5037_v10 }
 0x110   :  { %2067 = vmatmul.f32.vlgmr.msra.gmra.mxu0 %v5016_v38  ;;  %2093 = vmatpush.msra.mxu1 %v4116_v31  ;;  %v5038_v31 = vand.u32 4294901760, %v4451_v32  ;;  %v2233_v56 = vsub.f32 %v4484_v61, %v4934_v41 }
 0x111   :  { %2124 = vmatpush.msrb.mxu2 %v4375_v6  ;;  %2199 = vmatpush.msrb.mxu3 %v2198_v63  ;;  %v4513_v63 = vsub.f32 %v25_v60, %v4491_v37  ;;  %v4526_v60 = vsub.f32 %v21_v45, %v4503_v15 }
 0x112   :  { %2268 = vmatpush.msrb.mxu0 %v4304_v2  ;;  %2095 = vmatpush.msra.mxu1 %v4145_v0  ;;  %v2221_v57 = vsub.f32 %v4451_v32, %v5038_v31  ;;  %v5039_v0 = vand.u32 4294901760, %v4466_v55  ;;  %v5040_v31 = vld [vmem:[#allocation19_spill] sm:$0xff] }
 0x113   :  { %2126 = vmatpush.msrb.mxu2 %v4387_v24  ;;  %2205 = vmatpush.msrb.mxu3 %v2204_v3  ;;  %v842_v13 = vadd.f32 %v841_v22, %v5040_v31  ;;  %v4935_v41 = vand.u32 4294901760, %v4526_v60 }
 0x114   :  { %2271 = vmatpush.msrb.mxu0 %v4314_v16  ;;  %2097 = vmatpush.msra.mxu1 %v4164_v40  ;;  %v2227_v10 = vsub.f32 %v4466_v55, %v5039_v0  ;;  %v2222_v40 = vand.u32 4294901760, %v2221_v57 }
 0x115   :  { %2128 = vmatpush.msrb.mxu2 %v4409_v46  ;;  %2211 = vmatpush.msrb.mxu3 %v2210_v9  ;;  %v4536_v22 = vpop.f32.mrf.mxu1  ;;  %v951_v3 = vadd.f32 %v950_v50, %v842_v13  ;;  %v2234_v9 = vand.u32 4294901760, %v2233_v56  ;;  %v5042_v50 = vand.u32 4294901760, %v4513_v63  ;;  %v2251_v56 = vsub.f32 %v4526_v60, %v4935_v41 }
 0x116   :  { %2274 = vmatpush.msrb.mxu0 %v4331_v59  ;;  %2099 = vmatpush.msra.mxu1 %v4175_v19  ;;  %v849_v0 = vpop.f32.mrf.mxu2  ;;  %v2228_v45 = vand.u32 4294901760, %v2227_v10  ;;  %v5041_v19 = vand.u32 4294901760, %v4501_v36 }
 0x117   :  { %2101 = vmatmul.f32.vlgmr.msra.gmra.mxu1 %v5016_v38  ;;  %2130 = vmatpush.msrb.mxu2 %v4425_v12  ;;  %v2245_v13 = vsub.f32 %v4513_v63, %v5042_v50  ;;  %v5043_v50 = vld [vmem:[#allocation23_spill] sm:$0xff] }
 0x118   :  { %2217 = vmatpush.msrb.mxu3 %v2216_v52  ;;  %2277 = vmatpush.msrb.mxu0 %v4344_v58  ;;  %v2239_v57 = vsub.f32 %v4501_v36, %v5041_v19  ;;  %v954_v10 = vpop.f32.mrf.mxu3  ;;  %v1009_v52 = vadd.f32 %v4445_v29, %v951_v3  ;;  %v1206_v19 = vpop.f32.mrf.mxu0  ;;  %v850_v31 = vadd.f32 %v849_v0, %v5043_v50 }
 0x119   :  { %2323 = vmatpush.msrb.mxu1 %v4259_v44  ;;  %2071 = vmatmul.f32.gmra.mxu0 %v5029_v17  ;;  %v2246_v29 = vand.u32 4294901760, %v2245_v13 }
 0x11a   :  { %2132 = vmatpush.msrb.mxu2 %v4438_v8  ;;  %2223 = vmatpush.msrb.mxu3 %v2222_v40  ;;  %v2240_v40 = vand.u32 4294901760, %v2239_v57  ;;  %v1053_v3 = vadd.f32 %v4479_v23, %v1009_v52  ;;  %v955_v0 = vadd.f32 %v954_v10, %v850_v31  ;;  %v5044_v23 = vand.u32 4294901760, %v4277_v47 }
 0x11b   :  { %2280 = vmatpush.msrb.mxu0 %v4364_v35  ;;  %2325 = vmatpush.msrb.mxu1 %v4279_v33 }
 0x11c   :  { %2134 = vmatpush.msrb.mxu2 %v4453_v49  ;;  %2229 = vmatpush.msrb.mxu3 %v2228_v45  ;;  %v2252_v45 = vand.u32 4294901760, %v2251_v56  ;;  %v5045_v56 = vand.u32 4294901760, %v4304_v2  ;;  %v1014_v31 = vadd.f32 %v4515_v28, %v955_v0  ;;  %v113_v2 = vld [vmem:[%s4851_s1 + $0x2f8] sm:$0xff] }
 0x11d   :  { %2283 = vmatpush.msrb.mxu0 %v4385_v20  ;;  %2327 = vmatpush.msrb.mxu1 %v4289_v21 }
 0x11e   :  { %2136 = vmatpush.msrb.mxu2 %v4477_v43  ;;  %2235 = vmatpush.msrb.mxu3 %v2234_v9  ;;  %v117_v9 = vld [vmem:[%s4851_s1 + $0x318] sm:$0xf]  ;;  %v1059_v28 = vadd.f32 %v4536_v22, %v1014_v31 }
 0x11f   :  { %2286 = vmatpush.msrb.mxu0 %v4402_v11  ;;  %2329 = vmatpush.msrb.mxu1 %v4306_v48  ;;  %v148_v52 = vsel %vm137_vm0, %v117_v9, 0  ;;  %v105_v22 = vld [vmem:[%s4851_s1 + $0x2b8] sm:$0xff] }
 0x120   :  { %2105 = vmatmul.f32.gmra.mxu1 %v5029_v17  ;;  %2138 = vmatpush.msrb.mxu2 %v4491_v37  ;;  %v1127_v41 = vpop.f32.mrf.mxu2  ;;  %v4588_v10 = vand.u32 4294901760, %v148_v52 }
 0x121   :  { %2241 = vmatpush.msrb.mxu3 %v2240_v40  ;;  %2289 = vmatpush.msrb.mxu0 %v4415_v53  ;;  %v1280_v57 = vpop.f32.mrf.mxu1  ;;  %v1128_v13 = vadd.f32 %v1127_v41, %v1053_v3  ;;  %v4583_v47 = vpop.f32.mrf.mxu0  ;;  %v5046_v41 = vand.u32 4294901760, %v4314_v16  ;;  %v109_v16 = vld [vmem:[%s4851_s1 + $0x2d8] sm:$0xff]  ;;  %v4604_v3 = vand.u32 4294901760, %v113_v2 }
 0x122   :  { %2331 = vmatpush.msrb.mxu1 %v4316_v7  ;;  %2140 = vmatpush.msrb.mxu2 %v4503_v15  ;;  %v1168_v40 = vpop.f32.mrf.mxu3  ;;  %v4619_v0 = vand.u32 4294901760, %v109_v16 }
 0x123   :  { %2247 = vmatpush.msrb.mxu3 %v2246_v29  ;;  %2292 = vmatpush.msrb.mxu0 %v4436_v54  ;;  %v1169_v29 = vadd.f32 %v1168_v40, %v1128_v13  ;;  %v5049_v13 = vand.u32 4294901760, %v4364_v35  ;;  %v5050_v35 = vand.u32 4294901760, %v4385_v20 }
 0x124   :  { %2333 = vmatpush.msrb.mxu1 %v4335_v39  ;;  %2370 = vmatpush.msra.mxu2 %v5044_v23  ;;  %v4646_v31 = vsub.f32 %v109_v16, %v4619_v0 }
 0x125   :  { %2253 = vmatpush.msrb.mxu3 %v2252_v45  ;;  %2295 = vmatpush.msrb.mxu0 %v4451_v32  ;;  %v5048_v45 = vand.u32 4294901760, %v4344_v58  ;;  %v1207_v9 = vadd.f32 %v1206_v19, %v1169_v29  ;;  %v101_v58 = vld [vmem:[%s4851_s1 + $0x298] sm:$0xff]  ;;  %v4629_v19 = vand.u32 4294901760, %v105_v22 }
 0x126   :  { %2335 = vmatpush.msrb.mxu1 %v4358_v34  ;;  %2374 = vmatpush.msra.mxu2 %v5045_v56  ;;  %v4640_v56 = vand.u32 4294901760, %v101_v58 }
 0x127   :  { %2441 = vmatpush.msra.mxu3 %v4259_v44  ;;  %2298 = vmatpush.msrb.mxu0 %v4466_v55  ;;  %v5047_v44 = vand.u32 4294901760, %v4331_v59  ;;  %v4612_v59 = vsub.f32 %v148_v52, %v4588_v10  ;;  %v1281_v40 = vadd.f32 %v1280_v57, %v1207_v9  ;;  %v4657_v29 = vsub.f32 %v105_v22, %v4629_v19 }
 0x128   :  { %2337 = vmatpush.msrb.mxu1 %v4375_v6  ;;  %2378 = vmatpush.msra.mxu2 %v5046_v41  ;;  %v5052_v22 = vand.u32 4294901760, %v4415_v53 }
 0x129   :  { %2443 = vmatpush.msra.mxu3 %v4279_v33  ;;  %2301 = vmatpush.msrb.mxu0 %v4484_v61 }
 0x12a   :  { %2339 = vmatpush.msrb.mxu1 %v4387_v24  ;;  %2382 = vmatpush.msra.mxu2 %v5047_v44  ;;  %v5051_v44 = vand.u32 4294901760, %v4402_v11  ;;  %v89_v11 = vld [vmem:[%s4851_s1 + $0x238] sm:$0xff] }
 0x12b   :  { %2445 = vmatpush.msra.mxu3 %v4289_v21  ;;  %2304 = vmatpush.msrb.mxu0 %v4501_v36  ;;  %v4606_v33 = vpop.f32.mrf.mxu1 }
 0x12c   :  { %2341 = vmatpush.msrb.mxu1 %v4409_v46  ;;  %2386 = vmatpush.msra.mxu2 %v5048_v45  ;;  %v1131_v21 = vpop.f32.mrf.mxu2  ;;  %v1324_v41 = vpop.f32.mrf.mxu0  ;;  %v4674_v45 = vsub.f32 %v101_v58, %v4640_v56 }
 0x12d   :  { %2447 = vmatpush.msra.mxu3 %v4306_v48  ;;  %2307 = vmatpush.msrb.mxu0 %v4513_v63  ;;  %v1132_v23 = vadd.f32 %v1131_v21, %v1059_v28  ;;  %v4632_v48 = vsub.f32 %v113_v2, %v4604_v3  ;;  %v93_v2 = vld [vmem:[%s4851_s1 + $0x258] sm:$0xff]  ;;  %v2544_v28 = vand.u32 4294901760, %v4646_v31 }
 0x12e   :  { %2343 = vmatpush.msrb.mxu1 %v4425_v12  ;;  %2146 = vmatmul.f32.vlgmr.msrb.gmra.mxu2 %v3205_v4  ;;  %v2532_v4 = vand.u32 4294901760, %v4612_v59  ;;  %v4679_v9 = vand.u32 4294901760, %v93_v2 }
 0x12f   :  { %2390 = vmatpush.msra.mxu2 %v5049_v13  ;;  %2449 = vmatpush.msra.mxu3 %v4316_v7  ;;  %v1172_v52 = vpop.f32.mrf.mxu3  ;;  %v97_v7 = vld [vmem:[%s4851_s1 + $0x278] sm:$0xff]  ;;  %v2538_v20 = vand.u32 4294901760, %v4632_v48 }
 0x130   :  { %2310 = vmatpush.msrb.mxu0 %v4526_v60  ;;  %2345 = vmatpush.msrb.mxu1 %v4438_v8  ;;  %v1173_v57 = vadd.f32 %v1172_v52, %v1132_v23  ;;  %v4665_v16 = vand.u32 4294901760, %v97_v7  ;;  %v2550_v52 = vand.u32 4294901760, %v4657_v29 }
 0x131   :  { %2255 = vmatmul.f32.vlgmr.msrb.gmra.mxu3 %v5012_v18  ;;  %2394 = vmatpush.msra.mxu2 %v5050_v35  ;;  %v2539_v58 = vsub.f32 %v4632_v48, %v2538_v20 }
 0x132   :  { %2451 = vmatpush.msra.mxu3 %v4335_v39  ;;  %2489 = vmatpush.msra.mxu0 %v4588_v10  ;;  %v2533_v39 = vsub.f32 %v4612_v59, %v2532_v4  ;;  %v1215_v21 = vadd.f32 %v4583_v47, %v1173_v57  ;;  %v4693_v47 = vand.u32 4294901760, %v89_v11  ;;  %v5053_v57 = vand.u32 4294901760, %v4436_v54 }
 0x133   :  { %2347 = vmatpush.msrb.mxu1 %v4453_v49  ;;  %2313 = vmatmul.f32.vlgmr.msrb.gmra.mxu0 %v3135_v42  ;;  %v1325_v42 = vadd.f32 %v1324_v41, %v1281_v40  ;;  %v4696_v40 = vsub.f32 %v97_v7, %v4665_v16  ;;  %v4710_v7 = vsub.f32 %v93_v2, %v4679_v9 }
 0x134   :  { %2398 = vmatpush.msra.mxu2 %v5051_v44  ;;  %2453 = vmatpush.msra.mxu3 %v4358_v34  ;;  %v2534_v53 = vand.u32 4294901760, %v2533_v39  ;;  %v2545_v44 = vsub.f32 %v4646_v31, %v2544_v28  ;;  %v1285_v54 = vadd.f32 %v4606_v33, %v1215_v21  ;;  %v5055_v21 = vand.u32 4294901760, %v4466_v55 }
 0x135   :  { %2491 = vmatpush.msra.mxu0 %v4604_v3  ;;  %2349 = vmatpush.msrb.mxu1 %v4477_v43  ;;  %v1361_v34 = vpop.f32.mrf.mxu1  ;;  %v2562_v2 = vand.u32 4294901760, %v4696_v40  ;;  %v5056_v55 = vand.u32 4294901760, %v4484_v61 }
 0x136   :  { %2402 = vmatpush.msra.mxu2 %v5052_v22  ;;  %2455 = vmatpush.msra.mxu3 %v4375_v6  ;;  %v1362_v23 = vadd.f32 %v1361_v34, %v1325_v42  ;;  %v1415_v13 = vpop.f32.mrf.mxu2  ;;  %v85_v6 = vld [vmem:[%s4851_s1 + $0x218] sm:$0xff]  ;;  %v5054_v42 = vand.u32 4294901760, %v4451_v32  ;;  %v2540_v34 = vand.u32 4294901760, %v2539_v58  ;;  %v2551_v22 = vsub.f32 %v4657_v29, %v2550_v52 }
 0x137   :  { %2493 = vmatpush.msra.mxu0 %v4619_v0  ;;  %2351 = vmatpush.msrb.mxu1 %v4491_v37  ;;  %v2568_v58 = vand.u32 4294901760, %v4710_v7 }
 0x138   :  { %2154 = vmatmul.f32.gmra.mxu2 %v5011_v30  ;;  %2457 = vmatpush.msra.mxu3 %v4387_v24  ;;  %v1416_v35 = vadd.f32 %v1415_v13, %v1362_v23  ;;  %v1449_v41 = vpop.f32.mrf.mxu3  ;;  %v2556_v30 = vand.u32 4294901760, %v4674_v45  ;;  %v4707_v24 = vand.u32 4294901760, %v85_v6  ;;  %v1329_v23 = vpop.f32.mrf.mxu0  ;;  %v4722_v13 = vsub.f32 %v89_v11, %v4693_v47 }
 0x139   :  { %2406 = vmatpush.msra.mxu2 %v5053_v57  ;;  %2495 = vmatpush.msra.mxu0 %v4629_v19 }
 0x13a   :  { %2353 = vmatpush.msrb.mxu1 %v4503_v15  ;;  %2259 = vmatmul.f32.gmra.mxu3 %v5025_v14  ;;  %v1450_v39 = vadd.f32 %v1449_v41, %v1416_v35  ;;  %v2557_v32 = vsub.f32 %v4674_v45, %v2556_v30  ;;  %v4734_v11 = vsub.f32 %v85_v6, %v4707_v24  ;;  %v2574_v6 = vand.u32 4294901760, %v4722_v13 }
 0x13b   :  { %2410 = vmatpush.msra.mxu2 %v5054_v42  ;;  %2459 = vmatpush.msra.mxu3 %v4409_v46  ;;  %v2546_v46 = vand.u32 4294901760, %v2545_v44  ;;  %v5057_v44 = vand.u32 4294901760, %v4501_v36  ;;  %v5058_v42 = vand.u32 4294901760, %v4513_v63 }
 0x13c   :  { %2497 = vmatpush.msra.mxu0 %v4640_v56  ;;  %2535 = vmatpush.msra.mxu1 %v2534_v53  ;;  %v2763_v33 = vmax.f32 %v1450_v39, 0.0  ;;  %v1330_v53 = vadd.f32 %v1329_v23, %v1285_v54  ;;  %v2558_v57 = vand.u32 4294901760, %v2557_v32  ;;  %v2580_v61 = vand.u32 4294901760, %v4734_v11 }
 0x13d   :  { %2318 = vmatmul.f32.gmra.mxu0 %v3199_v62  ;;  %2357 = vmatmul.f32.vlgmr.msrb.gmra.mxu1 %v3163_v26  ;;  %v2552_v26 = vand.u32 4294901760, %v2551_v22 }
 0x13e   :  { %2414 = vmatpush.msra.mxu2 %v5055_v21  ;;  %2461 = vmatpush.msra.mxu3 %v4425_v12  ;;  %2771 = vst [vmem:[%s4854_s3 + $0x8] sm:$0xff] %v2763_v33  ;;  %v2563_v12 = vsub.f32 %v4696_v40, %v2562_v2  ;;  %v2581_v63 = vsub.f32 %v4734_v11, %v2580_v61 }
 0x13f   :  { %2499 = vmatpush.msra.mxu0 %v4665_v16  ;;  %2541 = vmatpush.msra.mxu1 %v2540_v34  ;;  %v1367_v62 = vpop.f32.mrf.mxu1 }
 0x140   :  { %2418 = vmatpush.msra.mxu2 %v5056_v55  ;;  %2463 = vmatpush.msra.mxu3 %v4438_v8  ;;  %v1368_v35 = vadd.f32 %v1367_v62, %v1330_v53  ;;  %v1419_v41 = vpop.f32.mrf.mxu2  ;;  %v2569_v8 = vsub.f32 %v4710_v7, %v2568_v58  ;;  %v2564_v36 = vand.u32 4294901760, %v2563_v12 }
 0x141   :  { %2501 = vmatpush.msra.mxu0 %v4679_v9  ;;  %2547 = vmatpush.msra.mxu1 %v2546_v46 }
 0x142   :  { %2422 = vmatpush.msra.mxu2 %v5057_v44  ;;  %2465 = vmatpush.msra.mxu3 %v4453_v49  ;;  %v1420_v54 = vadd.f32 %v1419_v41, %v1368_v35  ;;  %v2575_v49 = vsub.f32 %v4722_v13, %v2574_v6  ;;  %v2570_v22 = vand.u32 4294901760, %v2569_v8 }
 0x143   :  { %2503 = vmatpush.msra.mxu0 %v4693_v47  ;;  %2553 = vmatpush.msra.mxu1 %v2552_v26  ;;  %v1453_v39 = vpop.f32.mrf.mxu3 }
 0x144   :  { %2426 = vmatpush.msra.mxu2 %v5058_v42  ;;  %2467 = vmatpush.msra.mxu3 %v4477_v43  ;;  %v1454_v34 = vadd.f32 %v1453_v39, %v1420_v54  ;;  %v5059_v43 = vand.u32 4294901760, %v4526_v60  ;;  %v2576_v33 = vand.u32 4294901760, %v2575_v49 }
 0x145   :  { %2505 = vmatpush.msra.mxu0 %v4707_v24  ;;  %2559 = vmatpush.msra.mxu1 %v2558_v57 }
 0x146   :  { %2363 = vmatmul.f32.gmra.mxu1 %v3220_v5  ;;  %v2767_v23 = vmax.f32 %v1454_v34, 0.0  ;;  %2430 = vmatpush.msra.mxu2 %v5059_v43  ;;  %v2582_v5 = vand.u32 4294901760, %v2581_v63 }
 0x147   :  { %2602 = vmatpush.msrb.mxu0 %v4612_v59  ;;  %2469 = vmatpush.msra.mxu3 %v4491_v37  ;;  %v5061_v37 = vld [vmem:[#allocation11_spill] sm:$0xff] }
 0x148   :  { %2511 = vmatmul.f32.vlgmr.msra.gmra.mxu0 %v5013_v51  ;;  %2565 = vmatpush.msra.mxu1 %v2564_v36  ;;  %2775 = vst [vmem:[%s4854_s3 + $0x28] sm:$0xff] %v2767_v23  ;;  %v5060_v51 = vld [vmem:[#allocation6_spill] sm:$0xff] }
 0x149   :  { %2432 = vmatmul.f32.vlgmr.msra.gmra.mxu2 %v5012_v18  ;;  %2605 = vmatpush.msrb.mxu0 %v4632_v48 }
 0x14a   :  { %2471 = vmatpush.msra.mxu3 %v4503_v15  ;;  %2571 = vmatpush.msra.mxu1 %v2570_v22 }
 0x14b   :  { %2473 = vmatmul.f32.vlgmr.msra.gmra.mxu3 %v5012_v18  ;;  %2608 = vmatpush.msrb.mxu0 %v4646_v31 }
 0x14c   :  { %2686 = vmatpush.msrb.mxu2 %v2532_v4  ;;  %2577 = vmatpush.msra.mxu1 %v2576_v33 }
 0x14d   :  { %2611 = vmatpush.msrb.mxu0 %v4657_v29  ;;  %2736 = vmatpush.msrb.mxu3 %v4588_v10 }
 0x14e   :  { %2690 = vmatpush.msrb.mxu2 %v2538_v20  ;;  %2583 = vmatpush.msra.mxu1 %v2582_v5 }
 0x14f   :  { %2614 = vmatpush.msrb.mxu0 %v4674_v45  ;;  %2738 = vmatpush.msrb.mxu3 %v4604_v3 }
 0x150   :  { %2646 = vmatpush.msrb.mxu1 %v4588_v10  ;;  %2694 = vmatpush.msrb.mxu2 %v2544_v28  ;;  %v5062_v10 = vld [vmem:[#allocation19_spill] sm:$0xff] }
 0x151   :  { %2519 = vmatmul.f32.gmra.mxu0 %v5026_v25  ;;  %2585 = vmatmul.f32.vlgmr.msra.gmra.mxu1 %v5016_v38 }
 0x152   :  { %2436 = vmatmul.f32.gmra.mxu2 %v5025_v14  ;;  %2617 = vmatpush.msrb.mxu0 %v4696_v40 }
 0x153   :  { %2648 = vmatpush.msrb.mxu1 %v4604_v3  ;;  %2698 = vmatpush.msrb.mxu2 %v2550_v52 }
 0x154   :  { %2740 = vmatpush.msrb.mxu3 %v4619_v0  ;;  %2620 = vmatpush.msrb.mxu0 %v4710_v7 }
 0x155   :  { %2477 = vmatmul.f32.gmra.mxu3 %v5025_v14  ;;  %2650 = vmatpush.msrb.mxu1 %v4619_v0 }
 0x156   :  { %2702 = vmatpush.msrb.mxu2 %v2556_v30  ;;  %2742 = vmatpush.msrb.mxu3 %v4629_v19 }
 0x157   :  { %2623 = vmatpush.msrb.mxu0 %v4722_v13  ;;  %2652 = vmatpush.msrb.mxu1 %v4629_v19 }
 0x158   :  { %2706 = vmatpush.msrb.mxu2 %v2562_v2  ;;  %2744 = vmatpush.msrb.mxu3 %v4640_v56 }
 0x159   :  { %2626 = vmatpush.msrb.mxu0 %v4734_v11  ;;  %2654 = vmatpush.msrb.mxu1 %v4640_v56 }
 0x15a   :  { %2710 = vmatpush.msrb.mxu2 %v2568_v58  ;;  %2746 = vmatpush.msrb.mxu3 %v4665_v16 }
 0x15b   :  { %2589 = vmatmul.f32.gmra.mxu1 %v5029_v17  ;;  %2629 = vmatmul.f32.vlgmr.msrb.gmra.mxu0 %v5034_v27 }
 0x15c   :  { %2656 = vmatpush.msrb.mxu1 %v4665_v16  ;;  %2714 = vmatpush.msrb.mxu2 %v2574_v6 }
 0x15d   :  { %2748 = vmatpush.msrb.mxu3 %v4679_v9  ;;  %v1661_v18 = vpop.f32.mrf.mxu2 }
 0x15e   :  { %2658 = vmatpush.msrb.mxu1 %v4679_v9  ;;  %2718 = vmatpush.msrb.mxu2 %v2580_v61 }
 0x15f   :  { %2750 = vmatpush.msrb.mxu3 %v4693_v47  ;;  %2720 = vmatmul.f32.vlgmr.msrb.gmra.mxu2 %v5016_v38 }
 0x160   :  { %2660 = vmatpush.msrb.mxu1 %v4693_v47  ;;  %v1705_v14 = vpop.f32.mrf.mxu3  ;;  %v1494_v25 = vpop.f32.mrf.mxu0 }
 0x161   :  { %2752 = vmatpush.msrb.mxu3 %v4707_v24  ;;  %v1495_v3 = vadd.f32 %v1494_v25, %v5062_v10 }
 0x162   :  { %2754 = vmatmul.f32.vlgmr.msrb.gmra.mxu3 %v5016_v38  ;;  %2662 = vmatpush.msrb.mxu1 %v4707_v24 }
 0x163   :  { %2634 = vmatmul.f32.gmra.mxu0 %v5036_v1  ;;  %2666 = vmatmul.f32.vlgmr.msrb.gmra.mxu1 %v5060_v51 }
 0x167   :  { %2724 = vmatmul.f32.gmra.mxu2 %v5029_v17  ;;  %v1666_v27 = vpop.f32.mrf.mxu2 }
 0x16a   :  { %2758 = vmatmul.f32.gmra.mxu3 %v5029_v17  ;;  %v1603_v15 = vpop.f32.mrf.mxu1  ;;  %v1711_v60 = vpop.f32.mrf.mxu3 }
 0x16b   :  { %2672 = vmatmul.f32.gmra.mxu1 %v5061_v37  ;;  %v1502_v38 = vpop.f32.mrf.mxu0  ;;  %v1604_v59 = vadd.f32 %v1603_v15, %v1495_v3 }
 0x16c   :  { %v1503_v4 = vadd.f32 %v1502_v38, %v5043_v50 }
 0x16d   :  { %v1662_v1 = vadd.f32 %v1661_v18, %v1604_v59 }
 0x16f   :  { %v1706_v56 = vadd.f32 %v1705_v14, %v1662_v1 }
 0x171   :  { %v1859_v0 = vpop.f32.mrf.mxu2 }
 0x173   :  { %v1933_v48 = vpop.f32.mrf.mxu3 }
 0x174   :  { %v1607_v19 = vpop.f32.mrf.mxu1  ;;  %v1780_v31 = vpop.f32.mrf.mxu0 }
 0x175   :  { %v1608_v20 = vadd.f32 %v1607_v19, %v1503_v4  ;;  %v1781_v16 = vadd.f32 %v1780_v31, %v1706_v56 }
 0x177   :  { %v1667_v28 = vadd.f32 %v1666_v27, %v1608_v20 }
 0x179   :  { %v1712_v47 = vadd.f32 %v1711_v60, %v1667_v28 }
 0x17b   :  { %v1867_v29 = vpop.f32.mrf.mxu2 }
 0x17d   :  { %v1937_v9 = vpop.f32.mrf.mxu3 }
 0x17f   :  { %v1821_v17 = vpop.f32.mrf.mxu1 }
 0x180   :  { %v1822_v45 = vadd.f32 %v1821_v17, %v1781_v16 }
 0x181   :  { %v1784_v40 = vpop.f32.mrf.mxu0 }
 0x182   :  { %v1860_v52 = vadd.f32 %v1859_v0, %v1822_v45  ;;  %v1785_v7 = vadd.f32 %v1784_v40, %v1712_v47 }
 0x184   :  { %v1934_v30 = vadd.f32 %v1933_v48, %v1860_v52 }
 0x185   :  { %v1977_v24 = vpop.f32.mrf.mxu2 }
 0x186   :  { %v1978_v46 = vadd.f32 %v1977_v24, %v1934_v30 }
 0x189   :  { %v1825_v2 = vpop.f32.mrf.mxu1  ;;  %v2014_v32 = vpop.f32.mrf.mxu3 }
 0x18a   :  { %v1826_v13 = vadd.f32 %v1825_v2, %v1785_v7  ;;  %v2015_v58 = vadd.f32 %v2014_v32, %v1978_v46 }
 0x18c   :  { %v1868_v21 = vadd.f32 %v1867_v29, %v1826_v13 }
 0x18d   :  { %v2068_v11 = vpop.f32.mrf.mxu0 }
 0x18e   :  { %v1938_v53 = vadd.f32 %v1937_v9, %v1868_v21  ;;  %v2069_v62 = vadd.f32 %v2068_v11, %v2015_v58 }
 0x18f   :  { %v1982_v26 = vpop.f32.mrf.mxu2 }
 0x190   :  { %v1983_v55 = vadd.f32 %v1982_v26, %v1938_v53 }
 0x192   :  { %v2020_v6 = vpop.f32.mrf.mxu3 }
 0x193   :  { %v2021_v57 = vadd.f32 %v2020_v6, %v1983_v55 }
 0x194   :  { %v2102_v12 = vpop.f32.mrf.mxu1 }
 0x195   :  { %v2103_v35 = vadd.f32 %v2102_v12, %v2069_v62 }
 0x196   :  { %v2072_v44 = vpop.f32.mrf.mxu0 }
 0x197   :  { %v2764_v41 = vmax.f32 %v2103_v35, 0.0  ;;  %v2073_v8 = vadd.f32 %v2072_v44, %v2021_v57 }
 0x199   :  { %2772 = vst [vmem:[%s4854_s3 + $0x10] sm:$0xff] %v2764_v41 }
 0x19d   :  { %v2106_v61 = vpop.f32.mrf.mxu1 }
 0x19e   :  { %v2107_v54 = vadd.f32 %v2106_v61, %v2073_v8 }
 0x1a0   :  { %v2768_v39 = vmax.f32 %v2107_v54, 0.0 }
 0x1a2   :  { %2776 = vst [vmem:[%s4854_s3 + $0x30] sm:$0xff] %v2768_v39 }
 0x1b0   :  { %v2314_v42 = vpop.f32.mrf.mxu0 }
 0x1b1   :  { %v2147_v36 = vpop.f32.mrf.mxu2 }
 0x1b2   :  { %v2148_v63 = vadd.f32 %v2147_v36, %v5062_v10 }
 0x1b4   :  { %v2256_v22 = vpop.f32.mrf.mxu3 }
 0x1b5   :  { %v2257_v33 = vadd.f32 %v2256_v22, %v2148_v63 }
 0x1b7   :  { %v2315_v51 = vadd.f32 %v2314_v42, %v2257_v33 }
 0x1ba   :  { %v2358_v49 = vpop.f32.mrf.mxu1  ;;  %v2319_v34 = vpop.f32.mrf.mxu0 }
 0x1bb   :  { %v2155_v23 = vpop.f32.mrf.mxu2  ;;  %v2359_v27 = vadd.f32 %v2358_v49, %v2315_v51 }
 0x1bc   :  { %v2156_v14 = vadd.f32 %v2155_v23, %v5043_v50 }
 0x1bd   :  { %v2260_v18 = vpop.f32.mrf.mxu3 }
 0x1be   :  { %v2261_v37 = vadd.f32 %v2260_v18, %v2156_v14 }
 0x1c0   :  { %v2320_v59 = vadd.f32 %v2319_v34, %v2261_v37 }
 0x1c3   :  { %v2364_v43 = vpop.f32.mrf.mxu1 }
 0x1c4   :  { %v2365_v19 = vadd.f32 %v2364_v43, %v2320_v59 }
 0x1c5   :  { %v2512_v5 = vpop.f32.mrf.mxu0 }
 0x1cc   :  { %v2433_v25 = vpop.f32.mrf.mxu2 }
 0x1cd   :  { %v2434_v60 = vadd.f32 %v2433_v25, %v2359_v27 }
 0x1ce   :  { %v2586_v15 = vpop.f32.mrf.mxu1  ;;  %v2474_v3 = vpop.f32.mrf.mxu3 }
 0x1cf   :  { %v2520_v38 = vpop.f32.mrf.mxu0  ;;  %v2475_v0 = vadd.f32 %v2474_v3, %v2434_v60 }
 0x1d1   :  { %v2513_v10 = vadd.f32 %v2512_v5, %v2475_v0 }
 0x1d3   :  { %v2587_v20 = vadd.f32 %v2586_v15, %v2513_v10 }
 0x1d5   :  { %v2437_v1 = vpop.f32.mrf.mxu2 }
 0x1d6   :  { %v2438_v48 = vadd.f32 %v2437_v1, %v2365_v19 }
 0x1d8   :  { %v2590_v4 = vpop.f32.mrf.mxu1  ;;  %v2478_v56 = vpop.f32.mrf.mxu3 }
 0x1d9   :  { %v2630_v31 = vpop.f32.mrf.mxu0  ;;  %v2479_v29 = vadd.f32 %v2478_v56, %v2438_v48 }
 0x1da   :  { %v2631_v16 = vadd.f32 %v2630_v31, %v2587_v20 }
 0x1db   :  { %v2521_v50 = vadd.f32 %v2520_v38, %v2479_v29 }
 0x1dd   :  { %v2591_v9 = vadd.f32 %v2590_v4, %v2521_v50 }
 0x1e0   :  { %v2667_v17 = vpop.f32.mrf.mxu1 }
 0x1e1   :  { %v2668_v28 = vadd.f32 %v2667_v17, %v2631_v16  ;;  %v2635_v47 = vpop.f32.mrf.mxu0 }
 0x1e2   :  { %v2721_v45 = vpop.f32.mrf.mxu2  ;;  %v2636_v24 = vadd.f32 %v2635_v47, %v2591_v9 }
 0x1e3   :  { %v2722_v52 = vadd.f32 %v2721_v45, %v2668_v28 }
 0x1e5   :  { %v2755_v40 = vpop.f32.mrf.mxu3 }
 0x1e6   :  { %v2756_v30 = vadd.f32 %v2755_v40, %v2722_v52 }
 0x1e8   :  { %v2765_v7 = vmax.f32 %v2756_v30, 0.0  ;;  %v2673_v2 = vpop.f32.mrf.mxu1 }
 0x1e9   :  { %v2674_v13 = vadd.f32 %v2673_v2, %v2636_v24 }
 0x1ea   :  { %2773 = vst [vmem:[%s4854_s3 + $0x18] sm:$0xff] %v2765_v7  ;;  %v2725_v46 = vpop.f32.mrf.mxu2 }
 0x1eb   :  { %v2726_v32 = vadd.f32 %v2725_v46, %v2674_v13 }
 0x1ed   :  { %v2759_v21 = vpop.f32.mrf.mxu3 }
 0x1ee   :  { %v2760_v58 = vadd.f32 %v2759_v21, %v2726_v32 }
 0x1f0   :  { %v2769_v11 = vmax.f32 %v2760_v58, 0.0 }
 0x1f2   :  { %2777 = vst [vmem:[%s4854_s3 + $0x38] sm:$0xff] %v2769_v11 }

</bundles_post_ra>
